<compile_context>
chip_gen: v7x
topology: tpu7x:2x2x1
jax: 0.10.0
libtpu: 0.0.40
codegen_flags: <defaults>
</compile_context>

<pallas_src>
import functools

import jax
import jax.numpy as jnp
from jax.experimental import pallas as pl
from jax.experimental.pallas import tpu as pltpu


HIDDEN_DIMS = (1024, 512, 256)   # hard-coded by the PyTorch module


# ----------------------------------------------------------------------------- kernel
def _fused_generator_kernel(x_ref,
                            w1_ref, g1_ref, be1_ref,
                            w2_ref, g2_ref, be2_ref,
                            w3_ref, g3_ref, be3_ref,
                            w4_ref, b4_ref,
                            o_ref, *, eps):
    """Whole core_net forward for one batch; all weights resident in VMEM."""

    def matmul(h, w_ref):
        # bf16 weights streamed from HBM; cast activations to bf16 at the MXU
        # boundary only, accumulate in f32 (single native MXU pass, no HIGHEST).
        return jnp.dot(h.astype(jnp.bfloat16), w_ref[...],
                       preferred_element_type=jnp.float32)

    def bn_relu(z, gamma_ref, beta_ref):
        # Training-mode BatchNorm1d: biased variance over the batch, eps inside
        # rsqrt.  The Linear bias is omitted upstream — it cancels exactly in
        # the mean subtraction.  All epilogue math in f32.
        inv_n = 1.0 / z.shape[0]
        mean = jnp.sum(z, axis=0, keepdims=True) * inv_n            # (1, C)
        diff = z - mean
        var = jnp.sum(diff * diff, axis=0, keepdims=True) * inv_n   # biased var
        scale = gamma_ref[...] * jax.lax.rsqrt(var + eps)
        return jnp.maximum(diff * scale + beta_ref[...], 0.0)

    h = x_ref[...].astype(jnp.float32)
    h = bn_relu(matmul(h, w1_ref), g1_ref, be1_ref)
    h = bn_relu(matmul(h, w2_ref), g2_ref, be2_ref)
    h = bn_relu(matmul(h, w3_ref), g3_ref, be3_ref)
    o_ref[...] = (matmul(h, w4_ref) + b4_ref[...]).astype(o_ref.dtype)


# ----------------------------------------------------------------------------- wrapper
def feature_generator_forward(params, x, *, eps=1e-5):
    if x.ndim == 4:                       # matches `X.view(X.size(0), -1)`
        x = x.reshape(x.shape[0], -1)
    n, input_size = x.shape

    (w1, _b1, g1, be1), (w2, _b2, g2, be2), (w3, _b3, g3, be3) = params["blocks"]
    w4, b4 = params["final"]
    d1, d2, d3 = w1.shape[1], w2.shape[1], w3.shape[1]
    assert w1.shape[0] == input_size and w4.shape == (d3, input_size)

    row = lambda v: v.reshape(1, -1).astype(jnp.float32)
    wcast = lambda w: w.astype(jnp.bfloat16)     # bf16 weight streaming (perf tradeoff)

    inputs = [
        x.astype(jnp.float32),
        wcast(w1), row(g1), row(be1),
        wcast(w2), row(g2), row(be2),
        wcast(w3), row(g3), row(be3),
        wcast(w4), row(b4),
    ]

    # --- VMEM budget guard (most acute on v7x: 32 MiB scoped / 64 MiB physical) ---
    in_bytes = sum(int(a.size) * a.dtype.itemsize for a in inputs)
    out_bytes = n * input_size * 4
    act_bytes = n * (2 * d1 + d2 + d3) * 4        # rough live f32 intermediates
    vmem_est = 2 * (in_bytes + out_bytes) + act_bytes   # inputs/outputs double-buffered
    assert vmem_est < 24 * 1024 * 1024, (
        "batch too large for the fully-fused, batch-resident kernel; "
        "a two-pass N-axis reduction variant is required"
    )

    cost = pl.CostEstimate(
        flops=2 * n * (input_size * d1 + d1 * d2 + d2 * d3 + d3 * input_size)
              + 10 * n * (d1 + d2 + d3),
        transcendentals=d1 + d2 + d3,                 # one rsqrt per BN channel
        bytes_accessed=in_bytes + out_bytes,          # each array DMA'd exactly once
    )

    full_block = lambda a: pl.BlockSpec(a.shape, lambda i: (0, 0))

    out = pl.pallas_call(
        functools.partial(_fused_generator_kernel, eps=eps),
        out_shape=jax.ShapeDtypeStruct((n, input_size), x.dtype),
        grid_spec=pltpu.PrefetchScalarGridSpec(
            num_scalar_prefetch=0,
            grid=(1,),
            in_specs=[full_block(a) for a in inputs],
            out_specs=pl.BlockSpec((n, input_size), lambda i: (0, 0)),
        ),
        compiler_params=pltpu.CompilerParams(
            dimension_semantics=("arbitrary",),
        ),
        cost_estimate=cost,
    )(*inputs)

    return out.reshape(n, -1, 1, 1)       # Expression: view(N, -1, 1, 1)


# ----------------------------------------------------------------------------- reference
def feature_generator_ref(params, x, *, eps=1e-5):
    """Pure-JAX reference (training-mode BN).  Mirrors the kernel's bf16 weight
    streaming (documented perf/precision tradeoff vs. the pure-f32 torch module);
    keeps the Linear bias before BN, which cancels in the mean subtraction."""
    if x.ndim == 4:
        x = x.reshape(x.shape[0], -1)

    def mm(h, w):
        return jnp.dot(h.astype(jnp.bfloat16), w.astype(jnp.bfloat16),
                       preferred_element_type=jnp.float32)

    h = x.astype(jnp.float32)
    for (w, b, g, bt) in params["blocks"]:
        z = mm(h, w) + b
        mean = jnp.mean(z, axis=0, keepdims=True)
        var = jnp.mean((z - mean) ** 2, axis=0, keepdims=True)
        h = jnp.maximum(g * ((z - mean) * jax.lax.rsqrt(var + eps)) + bt, 0.0)
    wf, bf = params["final"]
    out = mm(h, wf) + bf
    return out.reshape(out.shape[0], -1, 1, 1).astype(x.dtype)


# ----------------------------------------------------------------------------- test
if __name__ == "__main__":
    key = jax.random.PRNGKey(0)
    keys = jax.random.split(key, 16)

    batch = 8
    c, hh, ww = 8, 4, 4
    input_size = c * hh * ww              # 128 (flattened image features)
    dims = [input_size] + list(HIDDEN_DIMS)

    # 4-D input, flattened by forward() as in the PyTorch module.
    x = jax.random.normal(keys[0], (batch, c, hh, ww), dtype=jnp.float32)

    # Deterministic params. Linear weights stored as (in, out) = torch weight.T;
    # init ~ N(0, 0.01) / small bias per _initialize_weights, gamma~1, beta~0
    # (slightly perturbed to exercise the affine BN path).
    blocks = []
    ki = 1
    for d_in, d_out in zip(dims[:-1], dims[1:]):
        wgt = 0.01 * jax.random.normal(keys[ki], (d_in, d_out), dtype=jnp.float32)
        bias = 0.01 * jax.random.normal(keys[ki + 1], (d_out,), dtype=jnp.float32)
        gamma = 1.0 + 0.1 * jax.random.normal(keys[ki + 2], (d_out,), dtype=jnp.float32)
        beta = 0.1 * jax.random.normal(keys[ki + 3], (d_out,), dtype=jnp.float32)
        blocks.append((wgt, bias, gamma, beta))
        ki += 4
    wf = 0.01 * jax.random.normal(keys[13], (dims[-1], input_size), dtype=jnp.float32)
    bf = 0.01 * jax.random.normal(keys[14], (input_size,), dtype=jnp.float32)

    params = {"blocks": blocks, "final": (wf, bf)}

    fwd = jax.jit(functools.partial(feature_generator_forward, eps=1e-5))
    out = jax.block_until_ready(fwd(params, x))

    ref = feature_generator_ref(params, x, eps=1e-5)
    assert out.shape == (batch, input_size, 1, 1), out.shape
    max_err = float(jnp.max(jnp.abs(out - ref)))
    assert jnp.allclose(out, ref, atol=2e-3, rtol=2e-3), (
        "mismatch vs reference: max abs err = %g" % max_err
    )

    print("KERNEL_OK")
</pallas_src>

<mosaic_0001>
module attributes {stable_mosaic.version = 11 : i64} {
  func.func @_fused_generator_kernel(%arg0: i32, %arg1: memref<8x128xf32, #tpu.memory_space<vmem>>, %arg2: memref<128x1024xbf16, #tpu.memory_space<vmem>>, %arg3: memref<1x1024xf32, #tpu.memory_space<vmem>>, %arg4: memref<1x1024xf32, #tpu.memory_space<vmem>>, %arg5: memref<1024x512xbf16, #tpu.memory_space<vmem>>, %arg6: memref<1x512xf32, #tpu.memory_space<vmem>>, %arg7: memref<1x512xf32, #tpu.memory_space<vmem>>, %arg8: memref<512x256xbf16, #tpu.memory_space<vmem>>, %arg9: memref<1x256xf32, #tpu.memory_space<vmem>>, %arg10: memref<1x256xf32, #tpu.memory_space<vmem>>, %arg11: memref<256x128xbf16, #tpu.memory_space<vmem>>, %arg12: memref<1x128xf32, #tpu.memory_space<vmem>>, %arg13: memref<8x128xf32, #tpu.memory_space<vmem>>) attributes {dimension_semantics = [#tpu.dimension_semantics<arbitrary>], iteration_bounds = array<i64: 1>, scalar_prefetch = 0 : i64, scratch_operands = 0 : i64, tpu.core_type = #tpu.core_type<tc>, window_params = [{pipeline_mode = #tpu.pipeline_mode<synchronous>, transform_indices = @transform_0, window_bounds = array<i64: 8, 128>}, {pipeline_mode = #tpu.pipeline_mode<synchronous>, transform_indices = @transform_1, window_bounds = array<i64: 128, 1024>}, {pipeline_mode = #tpu.pipeline_mode<synchronous>, transform_indices = @transform_2, window_bounds = array<i64: 1, 1024>}, {pipeline_mode = #tpu.pipeline_mode<synchronous>, transform_indices = @transform_3, window_bounds = array<i64: 1, 1024>}, {pipeline_mode = #tpu.pipeline_mode<synchronous>, transform_indices = @transform_4, window_bounds = array<i64: 1024, 512>}, {pipeline_mode = #tpu.pipeline_mode<synchronous>, transform_indices = @transform_5, window_bounds = array<i64: 1, 512>}, {pipeline_mode = #tpu.pipeline_mode<synchronous>, transform_indices = @transform_6, window_bounds = array<i64: 1, 512>}, {pipeline_mode = #tpu.pipeline_mode<synchronous>, transform_indices = @transform_7, window_bounds = array<i64: 512, 256>}, {pipeline_mode = #tpu.pipeline_mode<synchronous>, transform_indices = @transform_8, window_bounds = array<i64: 1, 256>}, {pipeline_mode = #tpu.pipeline_mode<synchronous>, transform_indices = @transform_9, window_bounds = array<i64: 1, 256>}, {pipeline_mode = #tpu.pipeline_mode<synchronous>, transform_indices = @transform_10, window_bounds = array<i64: 256, 128>}, {pipeline_mode = #tpu.pipeline_mode<synchronous>, transform_indices = @transform_11, window_bounds = array<i64: 1, 128>}, {pipeline_mode = #tpu.pipeline_mode<synchronous>, transform_indices = @transform_12, window_bounds = array<i64: 8, 128>}]} {
    %c0 = arith.constant 0 : index
    %c0_0 = arith.constant 0 : index
    %0 = vector.load %arg1[%c0, %c0_0] : memref<8x128xf32, #tpu.memory_space<vmem>>, vector<8x128xf32>
    %1 = arith.truncf %0 : vector<8x128xf32> to vector<8x128xbf16>
    %c0_1 = arith.constant 0 : index
    %c0_2 = arith.constant 0 : index
    %2 = vector.load %arg2[%c0_1, %c0_2] : memref<128x1024xbf16, #tpu.memory_space<vmem>>, vector<128x1024xbf16>
    %cst = arith.constant dense<0.000000e+00> : vector<8x1024xf32>
    %3 = tpu.matmul %1, %2, %cst {dimension_numbers = #tpu.dot_dimension_numbers<[1], [0], [0], [1], [0, 0, 1, 1], [], []>} : vector<8x128xbf16>, vector<128x1024xbf16>, vector<8x1024xf32> -> vector<8x1024xf32>
    %cst_3 = arith.constant dense<0.000000e+00> : vector<1024xf32>
    %4 = vector.multi_reduction <add>, %3, %cst_3 [0] : vector<8x1024xf32> to vector<1024xf32>
    %5 = vector.shape_cast %4 : vector<1024xf32> to vector<1x1024xf32>
    %cst_4 = arith.constant 1.250000e-01 : f32
    %6 = vector.broadcast %cst_4 : f32 to vector<1x1024xf32>
    %7 = arith.mulf %5, %6 : vector<1x1024xf32>
    %8 = vector.broadcast %7 : vector<1x1024xf32> to vector<8x1024xf32>
    %9 = arith.subf %3, %8 : vector<8x1024xf32>
    %10 = arith.mulf %9, %9 : vector<8x1024xf32>
    %cst_5 = arith.constant dense<0.000000e+00> : vector<1024xf32>
    %11 = vector.multi_reduction <add>, %10, %cst_5 [0] : vector<8x1024xf32> to vector<1024xf32>
    %12 = vector.shape_cast %11 : vector<1024xf32> to vector<1x1024xf32>
    %cst_6 = arith.constant 1.250000e-01 : f32
    %13 = vector.broadcast %cst_6 : f32 to vector<1x1024xf32>
    %14 = arith.mulf %12, %13 : vector<1x1024xf32>
    %c0_7 = arith.constant 0 : index
    %c0_8 = arith.constant 0 : index
    %15 = vector.load %arg3[%c0_7, %c0_8] : memref<1x1024xf32, #tpu.memory_space<vmem>>, vector<1x1024xf32>
    %cst_9 = arith.constant 9.99999974E-6 : f32
    %16 = vector.broadcast %cst_9 : f32 to vector<1x1024xf32>
    %17 = arith.addf %14, %16 : vector<1x1024xf32>
    %18 = math.rsqrt %17 : vector<1x1024xf32>
    %19 = arith.mulf %15, %18 : vector<1x1024xf32>
    %20 = vector.broadcast %19 : vector<1x1024xf32> to vector<8x1024xf32>
    %21 = arith.mulf %9, %20 : vector<8x1024xf32>
    %c0_10 = arith.constant 0 : index
    %c0_11 = arith.constant 0 : index
    %22 = vector.load %arg4[%c0_10, %c0_11] : memref<1x1024xf32, #tpu.memory_space<vmem>>, vector<1x1024xf32>
    %23 = vector.broadcast %22 : vector<1x1024xf32> to vector<8x1024xf32>
    %24 = arith.addf %21, %23 : vector<8x1024xf32>
    %cst_12 = arith.constant 0.000000e+00 : f32
    %25 = vector.broadcast %cst_12 : f32 to vector<8x1024xf32>
    %26 = arith.maximumf %24, %25 : vector<8x1024xf32>
    %27 = arith.truncf %26 : vector<8x1024xf32> to vector<8x1024xbf16>
    %c0_13 = arith.constant 0 : index
    %c0_14 = arith.constant 0 : index
    %28 = vector.load %arg5[%c0_13, %c0_14] : memref<1024x512xbf16, #tpu.memory_space<vmem>>, vector<1024x512xbf16>
    %cst_15 = arith.constant dense<0.000000e+00> : vector<8x512xf32>
    %29 = tpu.matmul %27, %28, %cst_15 {dimension_numbers = #tpu.dot_dimension_numbers<[1], [0], [0], [1], [0, 0, 1, 1], [], []>} : vector<8x1024xbf16>, vector<1024x512xbf16>, vector<8x512xf32> -> vector<8x512xf32>
    %cst_16 = arith.constant dense<0.000000e+00> : vector<512xf32>
    %30 = vector.multi_reduction <add>, %29, %cst_16 [0] : vector<8x512xf32> to vector<512xf32>
    %31 = vector.shape_cast %30 : vector<512xf32> to vector<1x512xf32>
    %cst_17 = arith.constant 1.250000e-01 : f32
    %32 = vector.broadcast %cst_17 : f32 to vector<1x512xf32>
    %33 = arith.mulf %31, %32 : vector<1x512xf32>
    %34 = vector.broadcast %33 : vector<1x512xf32> to vector<8x512xf32>
    %35 = arith.subf %29, %34 : vector<8x512xf32>
    %36 = arith.mulf %35, %35 : vector<8x512xf32>
    %cst_18 = arith.constant dense<0.000000e+00> : vector<512xf32>
    %37 = vector.multi_reduction <add>, %36, %cst_18 [0] : vector<8x512xf32> to vector<512xf32>
    %38 = vector.shape_cast %37 : vector<512xf32> to vector<1x512xf32>
    %cst_19 = arith.constant 1.250000e-01 : f32
    %39 = vector.broadcast %cst_19 : f32 to vector<1x512xf32>
    %40 = arith.mulf %38, %39 : vector<1x512xf32>
    %c0_20 = arith.constant 0 : index
    %c0_21 = arith.constant 0 : index
    %41 = vector.load %arg6[%c0_20, %c0_21] : memref<1x512xf32, #tpu.memory_space<vmem>>, vector<1x512xf32>
    %cst_22 = arith.constant 9.99999974E-6 : f32
    %42 = vector.broadcast %cst_22 : f32 to vector<1x512xf32>
    %43 = arith.addf %40, %42 : vector<1x512xf32>
    %44 = math.rsqrt %43 : vector<1x512xf32>
    %45 = arith.mulf %41, %44 : vector<1x512xf32>
    %46 = vector.broadcast %45 : vector<1x512xf32> to vector<8x512xf32>
    %47 = arith.mulf %35, %46 : vector<8x512xf32>
    %c0_23 = arith.constant 0 : index
    %c0_24 = arith.constant 0 : index
    %48 = vector.load %arg7[%c0_23, %c0_24] : memref<1x512xf32, #tpu.memory_space<vmem>>, vector<1x512xf32>
    %49 = vector.broadcast %48 : vector<1x512xf32> to vector<8x512xf32>
    %50 = arith.addf %47, %49 : vector<8x512xf32>
    %cst_25 = arith.constant 0.000000e+00 : f32
    %51 = vector.broadcast %cst_25 : f32 to vector<8x512xf32>
    %52 = arith.maximumf %50, %51 : vector<8x512xf32>
    %53 = arith.truncf %52 : vector<8x512xf32> to vector<8x512xbf16>
    %c0_26 = arith.constant 0 : index
    %c0_27 = arith.constant 0 : index
    %54 = vector.load %arg8[%c0_26, %c0_27] : memref<512x256xbf16, #tpu.memory_space<vmem>>, vector<512x256xbf16>
    %cst_28 = arith.constant dense<0.000000e+00> : vector<8x256xf32>
    %55 = tpu.matmul %53, %54, %cst_28 {dimension_numbers = #tpu.dot_dimension_numbers<[1], [0], [0], [1], [0, 0, 1, 1], [], []>} : vector<8x512xbf16>, vector<512x256xbf16>, vector<8x256xf32> -> vector<8x256xf32>
    %cst_29 = arith.constant dense<0.000000e+00> : vector<256xf32>
    %56 = vector.multi_reduction <add>, %55, %cst_29 [0] : vector<8x256xf32> to vector<256xf32>
    %57 = vector.shape_cast %56 : vector<256xf32> to vector<1x256xf32>
    %cst_30 = arith.constant 1.250000e-01 : f32
    %58 = vector.broadcast %cst_30 : f32 to vector<1x256xf32>
    %59 = arith.mulf %57, %58 : vector<1x256xf32>
    %60 = vector.broadcast %59 : vector<1x256xf32> to vector<8x256xf32>
    %61 = arith.subf %55, %60 : vector<8x256xf32>
    %62 = arith.mulf %61, %61 : vector<8x256xf32>
    %cst_31 = arith.constant dense<0.000000e+00> : vector<256xf32>
    %63 = vector.multi_reduction <add>, %62, %cst_31 [0] : vector<8x256xf32> to vector<256xf32>
    %64 = vector.shape_cast %63 : vector<256xf32> to vector<1x256xf32>
    %cst_32 = arith.constant 1.250000e-01 : f32
    %65 = vector.broadcast %cst_32 : f32 to vector<1x256xf32>
    %66 = arith.mulf %64, %65 : vector<1x256xf32>
    %c0_33 = arith.constant 0 : index
    %c0_34 = arith.constant 0 : index
    %67 = vector.load %arg9[%c0_33, %c0_34] : memref<1x256xf32, #tpu.memory_space<vmem>>, vector<1x256xf32>
    %cst_35 = arith.constant 9.99999974E-6 : f32
    %68 = vector.broadcast %cst_35 : f32 to vector<1x256xf32>
    %69 = arith.addf %66, %68 : vector<1x256xf32>
    %70 = math.rsqrt %69 : vector<1x256xf32>
    %71 = arith.mulf %67, %70 : vector<1x256xf32>
    %72 = vector.broadcast %71 : vector<1x256xf32> to vector<8x256xf32>
    %73 = arith.mulf %61, %72 : vector<8x256xf32>
    %c0_36 = arith.constant 0 : index
    %c0_37 = arith.constant 0 : index
    %74 = vector.load %arg10[%c0_36, %c0_37] : memref<1x256xf32, #tpu.memory_space<vmem>>, vector<1x256xf32>
    %75 = vector.broadcast %74 : vector<1x256xf32> to vector<8x256xf32>
    %76 = arith.addf %73, %75 : vector<8x256xf32>
    %cst_38 = arith.constant 0.000000e+00 : f32
    %77 = vector.broadcast %cst_38 : f32 to vector<8x256xf32>
    %78 = arith.maximumf %76, %77 : vector<8x256xf32>
    %79 = arith.truncf %78 : vector<8x256xf32> to vector<8x256xbf16>
    %c0_39 = arith.constant 0 : index
    %c0_40 = arith.constant 0 : index
    %80 = vector.load %arg11[%c0_39, %c0_40] : memref<256x128xbf16, #tpu.memory_space<vmem>>, vector<256x128xbf16>
    %cst_41 = arith.constant dense<0.000000e+00> : vector<8x128xf32>
    %81 = tpu.matmul %79, %80, %cst_41 {dimension_numbers = #tpu.dot_dimension_numbers<[1], [0], [0], [1], [0, 0, 1, 1], [], []>} : vector<8x256xbf16>, vector<256x128xbf16>, vector<8x128xf32> -> vector<8x128xf32>
    %c0_42 = arith.constant 0 : index
    %c0_43 = arith.constant 0 : index
    %82 = vector.load %arg12[%c0_42, %c0_43] : memref<1x128xf32, #tpu.memory_space<vmem>>, vector<1x128xf32>
    %83 = vector.broadcast %82 : vector<1x128xf32> to vector<8x128xf32>
    %84 = arith.addf %81, %83 : vector<8x128xf32>
    %c0_44 = arith.constant 0 : index
    %c0_45 = arith.constant 0 : index
    %85 = vector.load %arg13[%c0_44, %c0_45] : memref<8x128xf32, #tpu.memory_space<vmem>>, vector<8x128xf32>
    tpu.vector_store %arg13[%c0_44, %c0_45], %84 {strides = array<i32>} : memref<8x128xf32, #tpu.memory_space<vmem>>, vector<8x128xf32>,
    return
  }
  func.func @transform_0(%arg0: i32) -> (i32, i32) {
    %c0_i32 = arith.constant 0 : i32
    %c0_i32_0 = arith.constant 0 : i32
    %c0_i32_1 = arith.constant 0 : i32
    return %c0_i32, %c0_i32_0 : i32, i32
  }
  func.func @transform_1(%arg0: i32) -> (i32, i32) {
    %c0_i32 = arith.constant 0 : i32
    %c0_i32_0 = arith.constant 0 : i32
    %c0_i32_1 = arith.constant 0 : i32
    return %c0_i32, %c0_i32_0 : i32, i32
  }
  func.func @transform_2(%arg0: i32) -> (i32, i32) {
    %c0_i32 = arith.constant 0 : i32
    %c0_i32_0 = arith.constant 0 : i32
    %c0_i32_1 = arith.constant 0 : i32
    return %c0_i32, %c0_i32_0 : i32, i32
  }
  func.func @transform_3(%arg0: i32) -> (i32, i32) {
    %c0_i32 = arith.constant 0 : i32
    %c0_i32_0 = arith.constant 0 : i32
    %c0_i32_1 = arith.constant 0 : i32
    return %c0_i32, %c0_i32_0 : i32, i32
  }
  func.func @transform_4(%arg0: i32) -> (i32, i32) {
    %c0_i32 = arith.constant 0 : i32
    %c0_i32_0 = arith.constant 0 : i32
    %c0_i32_1 = arith.constant 0 : i32
    return %c0_i32, %c0_i32_0 : i32, i32
  }
  func.func @transform_5(%arg0: i32) -> (i32, i32) {
    %c0_i32 = arith.constant 0 : i32
    %c0_i32_0 = arith.constant 0 : i32
    %c0_i32_1 = arith.constant 0 : i32
    return %c0_i32, %c0_i32_0 : i32, i32
  }
  func.func @transform_6(%arg0: i32) -> (i32, i32) {
    %c0_i32 = arith.constant 0 : i32
    %c0_i32_0 = arith.constant 0 : i32
    %c0_i32_1 = arith.constant 0 : i32
    return %c0_i32, %c0_i32_0 : i32, i32
  }
  func.func @transform_7(%arg0: i32) -> (i32, i32) {
    %c0_i32 = arith.constant 0 : i32
    %c0_i32_0 = arith.constant 0 : i32
    %c0_i32_1 = arith.constant 0 : i32
    return %c0_i32, %c0_i32_0 : i32, i32
  }
  func.func @transform_8(%arg0: i32) -> (i32, i32) {
    %c0_i32 = arith.constant 0 : i32
    %c0_i32_0 = arith.constant 0 : i32
    %c0_i32_1 = arith.constant 0 : i32
    return %c0_i32, %c0_i32_0 : i32, i32
  }
  func.func @transform_9(%arg0: i32) -> (i32, i32) {
    %c0_i32 = arith.constant 0 : i32
    %c0_i32_0 = arith.constant 0 : i32
    %c0_i32_1 = arith.constant 0 : i32
    return %c0_i32, %c0_i32_0 : i32, i32
  }
  func.func @transform_10(%arg0: i32) -> (i32, i32) {
    %c0_i32 = arith.constant 0 : i32
    %c0_i32_0 = arith.constant 0 : i32
    %c0_i32_1 = arith.constant 0 : i32
    return %c0_i32, %c0_i32_0 : i32, i32
  }
  func.func @transform_11(%arg0: i32) -> (i32, i32) {
    %c0_i32 = arith.constant 0 : i32
    %c0_i32_0 = arith.constant 0 : i32
    %c0_i32_1 = arith.constant 0 : i32
    return %c0_i32, %c0_i32_0 : i32, i32
  }
  func.func @transform_12(%arg0: i32) -> (i32, i32) {
    %c0_i32 = arith.constant 0 : i32
    %c0_i32_0 = arith.constant 0 : i32
    %c0_i32_1 = arith.constant 0 : i32
    return %c0_i32, %c0_i32_0 : i32, i32
  }
}

</mosaic_0001>

<bundles_post_ra>
// kernel: feature_generator_forward.1
= control target key start
LH: loop header
LB: loop body
LE: loop exit
PB: predicated region body
PF: predicated region fallthrough
CT: control target
= control target key end

     0   :  { %v4683_v6 = vmov 0   ;;  %s6141_s0 = inlined_call_operand.vmem [shape: f32[8,128], index: 0, kind: input, shape index: {}]   ;;  %s6142_s1 = inlined_call_operand.vmem [shape: bf16[128,1024], index: 1, kind: input, shape index: {}]   ;;  %s6143_s2 = inlined_call_operand.vmem [shape: f32[1,1024], index: 2, kind: input, shape index: {}]   ;;  %s6144_s3 = inlined_call_operand.vmem [shape: f32[1,1024], index: 3, kind: input, shape index: {}]   ;;  %s6145_s4 = inlined_call_operand.vmem [shape: bf16[1024,512], index: 4, kind: input, shape index: {}]   ;;  %s6146_s5 = inlined_call_operand.vmem [shape: f32[1,512], index: 5, kind: input, shape index: {}]   ;;  %s6147_s6 = inlined_call_operand.vmem [shape: f32[1,512], index: 6, kind: input, shape index: {}]   ;;  %s6148_s7 = inlined_call_operand.vmem [shape: bf16[512,256], index: 7, kind: input, shape index: {}]   ;;  %s6149_s8 = inlined_call_operand.vmem [shape: f32[1,256], index: 8, kind: input, shape index: {}]   ;;  %s6150_s9 = inlined_call_operand.vmem [shape: f32[1,256], index: 9, kind: input, shape index: {}]   ;;  %s6151_s10 = inlined_call_operand.vmem [shape: bf16[256,128], index: 10, kind: input, shape index: {}]   ;;  %s6152_s11 = inlined_call_operand.vmem [shape: f32[1,128], index: 11, kind: input, shape index: {}]   ;;  %s6153_s12 = inlined_call_operand.hbm [shape: f32[8,128], index: 12, kind: output, shape index: {}]  }
   0x1   :  { %v45_v0 = vld [vmem:[%s6142_s1] sm:$0xff]  ;;  %461 = vmatprep.mubr.bf16.mxu1 %v4683_v6  ;;  %543 = vmatprep.mubr.bf16.mxu0 %v4683_v6  ;;  %v47_v14 = vld [vmem:[%s6142_s1 + $0x10] sm:$0xff]  ;;  %v46_v52 = vld [vmem:[%s6142_s1 + $0x8] sm:$0xff] }
   0x2   :  { %v49_v1 = vld [vmem:[%s6142_s1 + $0x20] sm:$0xff]  ;;  %v51_v16 = vld [vmem:[%s6142_s1 + $0x30] sm:$0xff]  ;;  %v50_v53 = vld [vmem:[%s6142_s1 + $0x28] sm:$0xff] }
   0x3   :  { %v53_v2 = vld [vmem:[%s6142_s1 + $0x40] sm:$0xff]  ;;  %v3682_v3 = vcombine.high %v45_v0, %v49_v1  ;;  %v3681_v4 = vcombine.low %v45_v0, %v49_v1  ;;  %v3686_v19 = vcombine.high %v47_v14, %v51_v16  ;;  %v3685_v20 = vcombine.low %v47_v14, %v51_v16  ;;  %v55_v21 = vld [vmem:[%s6142_s1 + $0x50] sm:$0xff]  ;;  %v54_v61 = vld [vmem:[%s6142_s1 + $0x48] sm:$0xff] }
   0x4   :  { %v57_v5 = vld [vmem:[%s6142_s1 + $0x60] sm:$0xff]  ;;  %v59_v22 = vld [vmem:[%s6142_s1 + $0x70] sm:$0xff]  ;;  %v58_v62 = vld [vmem:[%s6142_s1 + $0x68] sm:$0xff]  ;;  %v3684_v0 = vcombine.high %v46_v52, %v50_v53 }
   0x5   :  { %v3690_v7 = vcombine.high %v53_v2, %v57_v5  ;;  %v61_v8 = vld [vmem:[%s6142_s1 + $0x80] sm:$0xff]  ;;  %429 = vmatprep.subr.bf16.mxu1 %v3682_v3  ;;  %v3689_v10 = vcombine.low %v53_v2, %v57_v5  ;;  %v3694_v24 = vcombine.high %v55_v21, %v59_v22  ;;  %v63_v25 = vld [vmem:[%s6142_s1 + $0x90] sm:$0xff]  ;;  %511 = vmatprep.subr.bf16.mxu0 %v3686_v19  ;;  %v74_v14 = vld [vmem:[%s6142_s1 + $0xe8] sm:$0xff] }
   0x6   :  { %v65_v9 = vld [vmem:[%s6142_s1 + $0xa0] sm:$0xff]  ;;  %430 = vmatpush1.bf16.msra.mxu1 %v3681_v4  ;;  %v67_v26 = vld [vmem:[%s6142_s1 + $0xb0] sm:$0xff]  ;;  %512 = vmatpush1.bf16.msra.mxu0 %v3685_v20  ;;  %v3693_v28 = vcombine.low %v55_v21, %v59_v22  ;;  %v3683_v5 = vcombine.low %v46_v52, %v50_v53  ;;  %v82_v19 = vld [vmem:[%s6142_s1 + $0x128] sm:$0xff] }
   0x7   :  { %431 = vmatprep.subr.bf16.mxu1 %v3690_v7  ;;  %v3698_v11 = vcombine.high %v61_v8, %v65_v9  ;;  %v69_v12 = vld [vmem:[%s6142_s1 + $0xc0] sm:$0xff]  ;;  %v3697_v15 = vcombine.low %v61_v8, %v65_v9  ;;  %513 = vmatprep.subr.bf16.mxu0 %v3694_v24  ;;  %v3702_v31 = vcombine.high %v63_v25, %v67_v26  ;;  %v71_v33 = vld [vmem:[%s6142_s1 + $0xd0] sm:$0xff]  ;;  %v62_v7 = vld [vmem:[%s6142_s1 + $0x88] sm:$0xff] }
   0x8   :  { %v73_v13 = vld [vmem:[%s6142_s1 + $0xe0] sm:$0xff]  ;;  %v75_v34 = vld [vmem:[%s6142_s1 + $0xf0] sm:$0xff]  ;;  %v3701_v36 = vcombine.low %v63_v25, %v67_v26  ;;  %v66_v8 = vld [vmem:[%s6142_s1 + $0xa8] sm:$0xff]  ;;  %v3692_v9 = vcombine.high %v54_v61, %v58_v62 }
   0x9   :  { %v3706_v17 = vcombine.high %v69_v12, %v73_v13  ;;  %v77_v18 = vld [vmem:[%s6142_s1 + $0x100] sm:$0xff]  ;;  %v3705_v27 = vcombine.low %v69_v12, %v73_v13  ;;  %v3710_v39 = vcombine.high %v71_v33, %v75_v34  ;;  %v79_v41 = vld [vmem:[%s6142_s1 + $0x110] sm:$0xff]  ;;  %v3709_v46 = vcombine.low %v71_v33, %v75_v34  ;;  %v70_v13 = vld [vmem:[%s6142_s1 + $0xc8] sm:$0xff] }
   0xa   :  { %432 = vmatpush1.bf16.msra.mxu1 %v3689_v10  ;;  %v81_v23 = vld [vmem:[%s6142_s1 + $0x120] sm:$0xff]  ;;  %514 = vmatpush1.bf16.msra.mxu0 %v3693_v28  ;;  %v83_v42 = vld [vmem:[%s6142_s1 + $0x130] sm:$0xff]  ;;  %v3691_v12 = vcombine.low %v54_v61, %v58_v62  ;;  %v3708_v20 = vcombine.high %v70_v13, %v74_v14  ;;  %v3707_v21 = vcombine.low %v70_v13, %v74_v14  ;;  %v86_v22 = vld [vmem:[%s6142_s1 + $0x148] sm:$0xff] }
   0xb   :  { %433 = vmatprep.subr.bf16.mxu1 %v3698_v11  ;;  %v3714_v29 = vcombine.high %v77_v18, %v81_v23  ;;  %v85_v30 = vld [vmem:[%s6142_s1 + $0x140] sm:$0xff]  ;;  %v3713_v35 = vcombine.low %v77_v18, %v81_v23  ;;  %515 = vmatprep.subr.bf16.mxu0 %v3702_v31  ;;  %v3718_v48 = vcombine.high %v79_v41, %v83_v42  ;;  %v87_v49 = vld [vmem:[%s6142_s1 + $0x150] sm:$0xff]  ;;  %v78_v18 = vld [vmem:[%s6142_s1 + $0x108] sm:$0xff] }
   0xc   :  { %v89_v32 = vld [vmem:[%s6142_s1 + $0x160] sm:$0xff]  ;;  %v91_v50 = vld [vmem:[%s6142_s1 + $0x170] sm:$0xff]  ;;  %v3717_v54 = vcombine.low %v79_v41, %v83_v42  ;;  %v90_v23 = vld [vmem:[%s6142_s1 + $0x168] sm:$0xff]  ;;  %v3716_v24 = vcombine.high %v78_v18, %v82_v19  ;;  %v3715_v25 = vcombine.low %v78_v18, %v82_v19 }
   0xd   :  { %v3722_v37 = vcombine.high %v85_v30, %v89_v32  ;;  %v93_v38 = vld [vmem:[%s6142_s1 + $0x180] sm:$0xff]  ;;  %v3721_v43 = vcombine.low %v85_v30, %v89_v32  ;;  %v95_v55 = vld [vmem:[%s6142_s1 + $0x190] sm:$0xff]  ;;  %v3726_v58 = vcombine.high %v87_v49, %v91_v50  ;;  %v3725_v63 = vcombine.low %v87_v49, %v91_v50  ;;  %v94_v26 = vld [vmem:[%s6142_s1 + $0x188] sm:$0xff] }
   0xe   :  { %434 = vmatpush1.bf16.msra.mxu1 %v3697_v15  ;;  %v97_v40 = vld [vmem:[%s6142_s1 + $0x1a0] sm:$0xff]  ;;  %516 = vmatpush1.bf16.msra.mxu0 %v3701_v36  ;;  %v99_v56 = vld [vmem:[%s6142_s1 + $0x1b0] sm:$0xff]  ;;  %v3700_v15 = vcombine.high %v62_v7, %v66_v8  ;;  %v3724_v28 = vcombine.high %v86_v22, %v90_v23  ;;  %v102_v30 = vld [vmem:[%s6142_s1 + $0x1c8] sm:$0xff] }
   0xf   :  { %435 = vmatprep.subr.bf16.mxu1 %v3706_v17  ;;  %v101_v44 = vld [vmem:[%s6142_s1 + $0x1c0] sm:$0xff]  ;;  %v3730_v47 = vcombine.high %v93_v38, %v97_v40  ;;  %517 = vmatprep.subr.bf16.mxu0 %v3710_v39  ;;  %v3729_v51 = vcombine.low %v93_v38, %v97_v40  ;;  %v3734_v1 = vcombine.high %v95_v55, %v99_v56  ;;  %v103_v2 = vld [vmem:[%s6142_s1 + $0x1d0] sm:$0xff]  ;;  %v106_v31 = vld [vmem:[%s6142_s1 + $0x1e8] sm:$0xff] }
  0x10   :  { %v105_v45 = vld [vmem:[%s6142_s1 + $0x1e0] sm:$0xff]  ;;  %v107_v3 = vld [vmem:[%s6142_s1 + $0x1f0] sm:$0xff]  ;;  %v3733_v10 = vcombine.low %v95_v55, %v99_v56  ;;  %v3699_v17 = vcombine.low %v62_v7, %v66_v8  ;;  %v48_v34 = vld [vmem:[%s6142_s1 + $0x18] sm:$0xff]  ;;  %v3740_v36 = vcombine.high %v102_v30, %v106_v31 }
  0x11   :  { %v3738_v57 = vcombine.high %v101_v44, %v105_v45  ;;  %v43_v59 = vld [vmem:[%s6141_s0] sm:$0xff]  ;;  %v3737_v60 = vcombine.low %v101_v44, %v105_v45  ;;  %v3742_v11 = vcombine.high %v103_v2, %v107_v3  ;;  %v3741_v16 = vcombine.low %v103_v2, %v107_v3  ;;  %v56_v38 = vld [vmem:[%s6142_s1 + $0x58] sm:$0xff] }
  0x12   :  { %436 = vmatpush1.bf16.msra.mxu1 %v3705_v27  ;;  %518 = vmatpush1.bf16.msra.mxu0 %v3709_v46  ;;  %v4864_v4 = vpack.c.bf16 %v43_v59, %v43_v59  ;;  %v98_v27 = vld [vmem:[%s6142_s1 + $0x1a8] sm:$0xff]  ;;  %v60_v39 = vld [vmem:[%s6142_s1 + $0x78] sm:$0xff] }
  0x13   :  { %437 = vmatprep.subr.bf16.mxu1 %v3714_v29  ;;  %519 = vmatprep.subr.bf16.mxu0 %v3718_v48  ;;  %v3723_v29 = vcombine.low %v86_v22, %v90_v23  ;;  %v3732_v32 = vcombine.high %v94_v26, %v98_v27  ;;  %v3731_v33 = vcombine.low %v94_v26, %v98_v27  ;;  %v64_v42 = vld [vmem:[%s6142_s1 + $0x98] sm:$0xff] }
  0x14   :  { %v3696_v44 = vcombine.high %v56_v38, %v60_v39  ;;  %v3695_v45 = vcombine.low %v56_v38, %v60_v39  ;;  %v72_v46 = vld [vmem:[%s6142_s1 + $0xd8] sm:$0xff] }
  0x15   :  { %v80_v50 = vld [vmem:[%s6142_s1 + $0x118] sm:$0xff] }
  0x16   :  { %438 = vmatpush1.bf16.msra.mxu1 %v3713_v35  ;;  %520 = vmatpush1.bf16.msra.mxu0 %v3717_v54  ;;  %v52_v35 = vld [vmem:[%s6142_s1 + $0x38] sm:$0xff] }
  0x17   :  { %439 = vmatprep.subr.bf16.mxu1 %v3722_v37  ;;  %521 = vmatprep.subr.bf16.mxu0 %v3726_v58  ;;  %v3739_v37 = vcombine.low %v102_v30, %v106_v31  ;;  %v3688_v40 = vcombine.high %v48_v34, %v52_v35  ;;  %v3687_v41 = vcombine.low %v48_v34, %v52_v35  ;;  %v92_v54 = vld [vmem:[%s6142_s1 + $0x178] sm:$0xff] }
  0x18   :  { %v100_v58 = vld [vmem:[%s6142_s1 + $0x1b8] sm:$0xff] }
  0x19   :  { %v104_v61 = vld [vmem:[%s6142_s1 + $0x1d8] sm:$0xff] }
  0x1a   :  { %440 = vmatpush1.bf16.msra.mxu1 %v3721_v43  ;;  %522 = vmatpush1.bf16.msra.mxu0 %v3725_v63  ;;  %v68_v43 = vld [vmem:[%s6142_s1 + $0xb8] sm:$0xff] }
  0x1b   :  { %441 = vmatprep.subr.bf16.mxu1 %v3730_v47  ;;  %523 = vmatprep.subr.bf16.mxu0 %v3734_v1  ;;  %v76_v47 = vld [vmem:[%s6142_s1 + $0xf8] sm:$0xff]  ;;  %v3704_v48 = vcombine.high %v64_v42, %v68_v43  ;;  %v3703_v49 = vcombine.low %v64_v42, %v68_v43 }
  0x1c   :  { %v3712_v52 = vcombine.high %v72_v46, %v76_v47  ;;  %v3711_v53 = vcombine.low %v72_v46, %v76_v47  ;;  %v108_v62 = vld [vmem:[%s6142_s1 + $0x1f8] sm:$0xff] }
  0x1d   :  { %v3744_v1 = vcombine.high %v104_v61, %v108_v62  ;;  %v3743_v2 = vcombine.low %v104_v61, %v108_v62 }
  0x1e   :  { %442 = vmatpush1.bf16.msra.mxu1 %v3729_v51  ;;  %524 = vmatpush1.bf16.msra.mxu0 %v3733_v10  ;;  %v84_v51 = vld [vmem:[%s6142_s1 + $0x138] sm:$0xff] }
  0x1f   :  { %443 = vmatprep.subr.bf16.mxu1 %v3738_v57  ;;  %525 = vmatprep.subr.bf16.mxu0 %v3742_v11  ;;  %v3720_v55 = vcombine.high %v80_v50, %v84_v51  ;;  %v3719_v56 = vcombine.low %v80_v50, %v84_v51  ;;  %v96_v57 = vld [vmem:[%s6142_s1 + $0x198] sm:$0xff] }
  0x20   :  { %v3736_v63 = vcombine.high %v96_v57, %v100_v58 }
  0x22   :  { %444 = vmatpush1.bf16.msra.mxu1 %v3737_v60  ;;  %526 = vmatpush1.bf16.msra.mxu0 %v3741_v16 }
  0x23   :  { %470 = vmatprep.subr.bf16.mxu1 %v3684_v0  ;;  %v3735_v0 = vcombine.low %v96_v57, %v100_v58 }
  0x25   :  { %462 = vmatmul.mubr.bf16.vlgmr.msra.gmra.mrb[0].mxu1 %v4864_v4  ;;  %544 = vmatmul.mubr.bf16.vlgmr.msra.gmra.mrb[0].mxu0 %v4864_v4 }
  0x26   :  { %471 = vmatpush1.bf16.msra.mxu1 %v3683_v5  ;;  %502 = vmatprep.mubr.bf16.mxu1 %v4683_v6 }
  0x27   :  { %472 = vmatprep.subr.bf16.mxu1 %v3692_v9 }
  0x2a   :  { %473 = vmatpush1.bf16.msra.mxu1 %v3691_v12 }
  0x2b   :  { %474 = vmatprep.subr.bf16.mxu1 %v3700_v15 }
  0x2e   :  { %475 = vmatpush1.bf16.msra.mxu1 %v3699_v17 }
  0x2f   :  { %476 = vmatprep.subr.bf16.mxu1 %v3708_v20 }
  0x32   :  { %477 = vmatpush1.bf16.msra.mxu1 %v3707_v21 }
  0x33   :  { %478 = vmatprep.subr.bf16.mxu1 %v3716_v24 }
  0x36   :  { %479 = vmatpush1.bf16.msra.mxu1 %v3715_v25 }
  0x37   :  { %480 = vmatprep.subr.bf16.mxu1 %v3724_v28 }
  0x3a   :  { %481 = vmatpush1.bf16.msra.mxu1 %v3723_v29 }
  0x3b   :  { %482 = vmatprep.subr.bf16.mxu1 %v3732_v32 }
  0x3e   :  { %483 = vmatpush1.bf16.msra.mxu1 %v3731_v33 }
  0x3f   :  { %484 = vmatprep.subr.bf16.mxu1 %v3740_v36 }
  0x42   :  { %485 = vmatpush1.bf16.msra.mxu1 %v3739_v37 }
  0x43   :  { %552 = vmatprep.subr.bf16.mxu1 %v3688_v40 }
  0x45   :  { %503 = vmatmul.mubr.bf16.vlgmr.msra.gmra.mrb[4].mxu1 %v4864_v4 }
  0x46   :  { %553 = vmatpush1.bf16.msra.mxu1 %v3687_v41  ;;  %584 = vmatprep.mubr.bf16.mxu1 %v4683_v6  ;;  %v88_v6 = vld [vmem:[%s6142_s1 + $0x158] sm:$0xff] }
  0x47   :  { %554 = vmatprep.subr.bf16.mxu1 %v3696_v44  ;;  %v3728_v59 = vcombine.high %v88_v6, %v92_v54  ;;  %v3727_v60 = vcombine.low %v88_v6, %v92_v54 }
  0x4a   :  { %555 = vmatpush1.bf16.msra.mxu1 %v3695_v45 }
  0x4b   :  { %556 = vmatprep.subr.bf16.mxu1 %v3704_v48 }
  0x4e   :  { %557 = vmatpush1.bf16.msra.mxu1 %v3703_v49 }
  0x4f   :  { %558 = vmatprep.subr.bf16.mxu1 %v3712_v52 }
  0x52   :  { %559 = vmatpush1.bf16.msra.mxu1 %v3711_v53 }
  0x53   :  { %560 = vmatprep.subr.bf16.mxu1 %v3720_v55 }
  0x56   :  { %561 = vmatpush1.bf16.msra.mxu1 %v3719_v56 }
  0x57   :  { %562 = vmatprep.subr.bf16.mxu1 %v3728_v59 }
  0x5a   :  { %563 = vmatpush1.bf16.msra.mxu1 %v3727_v60 }
  0x5b   :  { %564 = vmatprep.subr.bf16.mxu1 %v3736_v63 }
  0x5e   :  { %565 = vmatpush1.bf16.msra.mxu1 %v3735_v0 }
  0x5f   :  { %566 = vmatprep.subr.bf16.mxu1 %v3744_v1 }
  0x62   :  { %567 = vmatpush1.bf16.msra.mxu1 %v3743_v2 }
  0x65   :  { %585 = vmatmul.mubr.bf16.vlgmr.msra.gmra.mrb[8].mxu1 %v4864_v4 }
  0x66   :  { %17 = vsyncpa [#allocation3], 0  ;;  %v4137_v3 = vld [vmem:[%s6145_s4 + $0x4] ss:$16 sps:$4 sm:$0xff]   ;;  %v4140_v5 = vld [vmem:[%s6145_s4 + $0xc] ss:$16 sps:$4 sm:$0xff]  }
  0x67   :  { %v4135_v7 = vld [vmem:[%s6145_s4] ss:$16 sps:$4 sm:$0xff]   ;;  %v4138_v8 = vld [vmem:[%s6145_s4 + $0x8] ss:$16 sps:$4 sm:$0xff]   ;;  %2448 = vmatprep.subr.bf16.mxu0 %v4137_v3  ;;  %2612 = vmatprep.subr.bf16.mxu1 %v4140_v5  ;;  %v4143_v4 = vld [vmem:[%s6145_s4 + $0x24] ss:$16 sps:$4 sm:$0xff]  }
  0x68   :  { %2449 = vmatpush1.bf16.msra.mxu0 %v4135_v7  ;;  %2613 = vmatpush1.bf16.msra.mxu1 %v4138_v8  ;;  %v4146_v9 = vld [vmem:[%s6145_s4 + $0x2c] ss:$16 sps:$4 sm:$0xff]   ;;  %v4141_v10 = vld [vmem:[%s6145_s4 + $0x20] ss:$16 sps:$4 sm:$0xff]   ;;  %v4144_v11 = vld [vmem:[%s6145_s4 + $0x28] ss:$16 sps:$4 sm:$0xff]  }
  0x69   :  { %2450 = vmatprep.subr.bf16.mxu0 %v4143_v4  ;;  %2614 = vmatprep.subr.bf16.mxu1 %v4146_v9  ;;  %v4149_v12 = vld [vmem:[%s6145_s4 + $0x44] ss:$16 sps:$4 sm:$0xff]   ;;  %v4152_v13 = vld [vmem:[%s6145_s4 + $0x4c] ss:$16 sps:$4 sm:$0xff]   ;;  %v4147_v14 = vld [vmem:[%s6145_s4 + $0x40] ss:$16 sps:$4 sm:$0xff]  }
  0x6a   :  { %v4150_v15 = vld [vmem:[%s6145_s4 + $0x48] ss:$16 sps:$4 sm:$0xff]   ;;  %v4155_v16 = vld [vmem:[%s6145_s4 + $0x64] ss:$16 sps:$4 sm:$0xff]   ;;  %v4158_v17 = vld [vmem:[%s6145_s4 + $0x6c] ss:$16 sps:$4 sm:$0xff]  }
  0x6b   :  { %v4153_v18 = vld [vmem:[%s6145_s4 + $0x60] ss:$16 sps:$4 sm:$0xff]   ;;  %v4156_v19 = vld [vmem:[%s6145_s4 + $0x68] ss:$16 sps:$4 sm:$0xff]   ;;  %v4161_v20 = vld [vmem:[%s6145_s4 + $0x84] ss:$16 sps:$4 sm:$0xff]  }
  0x6c   :  { %2451 = vmatpush1.bf16.msra.mxu0 %v4141_v10  ;;  %2615 = vmatpush1.bf16.msra.mxu1 %v4144_v11  ;;  %v4164_v21 = vld [vmem:[%s6145_s4 + $0x8c] ss:$16 sps:$4 sm:$0xff]   ;;  %v4159_v22 = vld [vmem:[%s6145_s4 + $0x80] ss:$16 sps:$4 sm:$0xff]   ;;  %v4162_v23 = vld [vmem:[%s6145_s4 + $0x88] ss:$16 sps:$4 sm:$0xff]  }
  0x6d   :  { %2452 = vmatprep.subr.bf16.mxu0 %v4149_v12  ;;  %2616 = vmatprep.subr.bf16.mxu1 %v4152_v13  ;;  %v4167_v24 = vld [vmem:[%s6145_s4 + $0xa4] ss:$16 sps:$4 sm:$0xff]   ;;  %v4170_v25 = vld [vmem:[%s6145_s4 + $0xac] ss:$16 sps:$4 sm:$0xff]   ;;  %v4165_v26 = vld [vmem:[%s6145_s4 + $0xa0] ss:$16 sps:$4 sm:$0xff]  }
  0x6e   :  { %v4168_v27 = vld [vmem:[%s6145_s4 + $0xa8] ss:$16 sps:$4 sm:$0xff]   ;;  %v4173_v28 = vld [vmem:[%s6145_s4 + $0xc4] ss:$16 sps:$4 sm:$0xff]   ;;  %v4176_v29 = vld [vmem:[%s6145_s4 + $0xcc] ss:$16 sps:$4 sm:$0xff]  }
  0x6f   :  { %v4171_v30 = vld [vmem:[%s6145_s4 + $0xc0] ss:$16 sps:$4 sm:$0xff]   ;;  %v4174_v31 = vld [vmem:[%s6145_s4 + $0xc8] ss:$16 sps:$4 sm:$0xff]   ;;  %v4179_v32 = vld [vmem:[%s6145_s4 + $0xe4] ss:$16 sps:$4 sm:$0xff]  }
  0x70   :  { %2453 = vmatpush1.bf16.msra.mxu0 %v4147_v14  ;;  %2617 = vmatpush1.bf16.msra.mxu1 %v4150_v15  ;;  %v4182_v33 = vld [vmem:[%s6145_s4 + $0xec] ss:$16 sps:$4 sm:$0xff]   ;;  %v4177_v34 = vld [vmem:[%s6145_s4 + $0xe0] ss:$16 sps:$4 sm:$0xff]   ;;  %v4180_v35 = vld [vmem:[%s6145_s4 + $0xe8] ss:$16 sps:$4 sm:$0xff]  }
  0x71   :  { %2454 = vmatprep.subr.bf16.mxu0 %v4155_v16  ;;  %2618 = vmatprep.subr.bf16.mxu1 %v4158_v17  ;;  %v4185_v36 = vld [vmem:[%s6145_s4 + $0x104] ss:$16 sps:$4 sm:$0xff]   ;;  %v4188_v37 = vld [vmem:[%s6145_s4 + $0x10c] ss:$16 sps:$4 sm:$0xff]   ;;  %v4183_v38 = vld [vmem:[%s6145_s4 + $0x100] ss:$16 sps:$4 sm:$0xff]  }
  0x72   :  { %v4186_v39 = vld [vmem:[%s6145_s4 + $0x108] ss:$16 sps:$4 sm:$0xff]   ;;  %v4191_v40 = vld [vmem:[%s6145_s4 + $0x124] ss:$16 sps:$4 sm:$0xff]   ;;  %v4194_v41 = vld [vmem:[%s6145_s4 + $0x12c] ss:$16 sps:$4 sm:$0xff]  }
  0x73   :  { %v4189_v42 = vld [vmem:[%s6145_s4 + $0x120] ss:$16 sps:$4 sm:$0xff]   ;;  %v4192_v43 = vld [vmem:[%s6145_s4 + $0x128] ss:$16 sps:$4 sm:$0xff]   ;;  %v4197_v44 = vld [vmem:[%s6145_s4 + $0x144] ss:$16 sps:$4 sm:$0xff]  }
  0x74   :  { %2455 = vmatpush1.bf16.msra.mxu0 %v4153_v18  ;;  %2619 = vmatpush1.bf16.msra.mxu1 %v4156_v19  ;;  %v4200_v45 = vld [vmem:[%s6145_s4 + $0x14c] ss:$16 sps:$4 sm:$0xff]   ;;  %v4195_v46 = vld [vmem:[%s6145_s4 + $0x140] ss:$16 sps:$4 sm:$0xff]   ;;  %v4198_v47 = vld [vmem:[%s6145_s4 + $0x148] ss:$16 sps:$4 sm:$0xff]  }
  0x75   :  { %2456 = vmatprep.subr.bf16.mxu0 %v4161_v20  ;;  %2620 = vmatprep.subr.bf16.mxu1 %v4164_v21  ;;  %v4203_v48 = vld [vmem:[%s6145_s4 + $0x164] ss:$16 sps:$4 sm:$0xff]   ;;  %v4206_v49 = vld [vmem:[%s6145_s4 + $0x16c] ss:$16 sps:$4 sm:$0xff]   ;;  %v4201_v50 = vld [vmem:[%s6145_s4 + $0x160] ss:$16 sps:$4 sm:$0xff]  }
  0x76   :  { %v4204_v51 = vld [vmem:[%s6145_s4 + $0x168] ss:$16 sps:$4 sm:$0xff]   ;;  %v4209_v52 = vld [vmem:[%s6145_s4 + $0x184] ss:$16 sps:$4 sm:$0xff]   ;;  %v4212_v53 = vld [vmem:[%s6145_s4 + $0x18c] ss:$16 sps:$4 sm:$0xff]  }
  0x77   :  { %v4207_v6 = vld [vmem:[%s6145_s4 + $0x180] ss:$16 sps:$4 sm:$0xff]   ;;  %v4210_v54 = vld [vmem:[%s6145_s4 + $0x188] ss:$16 sps:$4 sm:$0xff]   ;;  %v4215_v55 = vld [vmem:[%s6145_s4 + $0x1a4] ss:$16 sps:$4 sm:$0xff]  }
  0x78   :  { %2457 = vmatpush1.bf16.msra.mxu0 %v4159_v22  ;;  %2621 = vmatpush1.bf16.msra.mxu1 %v4162_v23  ;;  %v4218_v56 = vld [vmem:[%s6145_s4 + $0x1ac] ss:$16 sps:$4 sm:$0xff]   ;;  %v4213_v57 = vld [vmem:[%s6145_s4 + $0x1a0] ss:$16 sps:$4 sm:$0xff]   ;;  %v4216_v58 = vld [vmem:[%s6145_s4 + $0x1a8] ss:$16 sps:$4 sm:$0xff]  }
  0x79   :  { %2458 = vmatprep.subr.bf16.mxu0 %v4167_v24  ;;  %2622 = vmatprep.subr.bf16.mxu1 %v4170_v25  ;;  %v4221_v59 = vld [vmem:[%s6145_s4 + $0x1c4] ss:$16 sps:$4 sm:$0xff]   ;;  %v4224_v60 = vld [vmem:[%s6145_s4 + $0x1cc] ss:$16 sps:$4 sm:$0xff]   ;;  %v4219_v61 = vld [vmem:[%s6145_s4 + $0x1c0] ss:$16 sps:$4 sm:$0xff]  }
  0x7a   :  { %v4222_v62 = vld [vmem:[%s6145_s4 + $0x1c8] ss:$16 sps:$4 sm:$0xff]   ;;  %v4227_v63 = vld [vmem:[%s6145_s4 + $0x1e4] ss:$16 sps:$4 sm:$0xff]   ;;  %v4225_v0 = vld [vmem:[%s6145_s4 + $0x1e0] ss:$16 sps:$4 sm:$0xff]  }
  0x7b   :  { %v4228_v1 = vld [vmem:[%s6145_s4 + $0x1e8] ss:$16 sps:$4 sm:$0xff]   ;;  %v4230_v2 = vld [vmem:[%s6145_s4 + $0x1ec] ss:$16 sps:$4 sm:$0xff]   ;;  %v4233_v11 = vld [vmem:[%s6145_s4 + $0x204] ss:$16 sps:$4 sm:$0xff]  }
  0x7c   :  { %2459 = vmatpush1.bf16.msra.mxu0 %v4165_v26  ;;  %2623 = vmatpush1.bf16.msra.mxu1 %v4168_v27  ;;  %v4236_v12 = vld [vmem:[%s6145_s4 + $0x20c] ss:$16 sps:$4 sm:$0xff]   ;;  %s4685_s18 = smov [#allocation2]  }
  0x7d   :  { %2460 = vmatprep.subr.bf16.mxu0 %v4173_v28  ;;  %2624 = vmatprep.subr.bf16.mxu1 %v4176_v29  ;;  %s3673_s19 = sshll.u32 %s4685_s18, 4  ;;  %s3674_s19 = int_to_ptr.vmem [resolvable:$true] %s3673_s19 }
  0x7e   :  { %s4659_s20 = scalar_lea.vmem %s3674_s19, 128  ;;  %p4664_p1 = scmp.lt.s32.totalorder %s3674_s19, %s3674_s19 }
  0x7f   :  { %p4660_p0 = scmp.ne.s32.totalorder %s3674_s19, %s4659_s20  ;;  %p4665_p2 = scmp.lt.s32.totalorder %s4659_s20, %s4659_s20 }
  0x80   :  { %2461 = vmatpush1.bf16.msra.mxu0 %v4171_v30  ;;  %2625 = vmatpush1.bf16.msra.mxu1 %v4174_v31 }
  0x81   :  { %2462 = vmatprep.subr.bf16.mxu0 %v4179_v32  ;;  %2626 = vmatprep.subr.bf16.mxu1 %v4182_v33  ;;  %p4666_p3 = por %p4665_p2, %p4664_p1 }
  0x83   :  { %p4667_p4 = pnand %p4666_p3, %p4660_p0 }
  0x84   :  { %2463 = vmatpush1.bf16.msra.mxu0 %v4177_v34  ;;  %2627 = vmatpush1.bf16.msra.mxu1 %v4180_v35 }
  0x85   :  { %2464 = vmatprep.subr.bf16.mxu0 %v4185_v36  ;;  %2628 = vmatprep.subr.bf16.mxu1 %v4188_v37 }
  0x88   :  { %2465 = vmatpush1.bf16.msra.mxu0 %v4183_v38  ;;  %2629 = vmatpush1.bf16.msra.mxu1 %v4186_v39 }
  0x89   :  { %2466 = vmatprep.subr.bf16.mxu0 %v4191_v40  ;;  %2630 = vmatprep.subr.bf16.mxu1 %v4194_v41 }
  0x8c   :  { %2467 = vmatpush1.bf16.msra.mxu0 %v4189_v42  ;;  %2631 = vmatpush1.bf16.msra.mxu1 %v4192_v43 }
  0x8d   :  { %2468 = vmatprep.subr.bf16.mxu0 %v4197_v44  ;;  %2632 = vmatprep.subr.bf16.mxu1 %v4200_v45 }
  0x90   :  { %2469 = vmatpush1.bf16.msra.mxu0 %v4195_v46  ;;  %2633 = vmatpush1.bf16.msra.mxu1 %v4198_v47 }
  0x91   :  { %2470 = vmatprep.subr.bf16.mxu0 %v4203_v48  ;;  %2634 = vmatprep.subr.bf16.mxu1 %v4206_v49 }
  0x94   :  { %2471 = vmatpush1.bf16.msra.mxu0 %v4201_v50  ;;  %2635 = vmatpush1.bf16.msra.mxu1 %v4204_v51 }
  0x95   :  { %2472 = vmatprep.subr.bf16.mxu0 %v4209_v52  ;;  %2636 = vmatprep.subr.bf16.mxu1 %v4212_v53 }
  0x98   :  { %2473 = vmatpush1.bf16.msra.mxu0 %v4207_v6  ;;  %2637 = vmatpush1.bf16.msra.mxu1 %v4210_v54 }
  0x99   :  { %2474 = vmatprep.subr.bf16.mxu0 %v4215_v55  ;;  %2638 = vmatprep.subr.bf16.mxu1 %v4218_v56 }
  0x9c   :  { %2475 = vmatpush1.bf16.msra.mxu0 %v4213_v57  ;;  %2639 = vmatpush1.bf16.msra.mxu1 %v4216_v58 }
  0x9d   :  { %2476 = vmatprep.subr.bf16.mxu0 %v4221_v59  ;;  %2640 = vmatprep.subr.bf16.mxu1 %v4224_v60 }
  0xa0   :  { %2477 = vmatpush1.bf16.msra.mxu0 %v4219_v61  ;;  %2641 = vmatpush1.bf16.msra.mxu1 %v4222_v62 }
  0xa1   :  { %2478 = vmatprep.subr.bf16.mxu0 %v4227_v63  ;;  %2642 = vmatprep.subr.bf16.mxu1 %v4230_v2 }
  0xa4   :  { %2479 = vmatpush1.bf16.msra.mxu0 %v4225_v0  ;;  %2643 = vmatpush1.bf16.msra.mxu1 %v4228_v1 }
  0xa5   :  { %2489 = vmatprep.subr.bf16.mxu0 %v4233_v11  ;;  %2653 = vmatprep.subr.bf16.mxu1 %v4236_v12 }
  0xf8   :  { %v463_v3 = vpop.f32.mrb[0].mxu1  ;;  %v5154_v19 = vpop.f32.mrb[0].mxu0 }
  0xf9   :  { %v593_v5 = vrot.slane %v463_v3, 4  ;;  %v465_v7 = vpop.f32.mrb[1].mxu1  ;;  %v5156_v21 = vpop.f32.mrb[1].mxu0  ;;  %v617_v41 = vrot.slane %v5154_v19, 4 }
  0xfa   :  { %v599_v8 = vrot.slane %v465_v7, 4  ;;  %v467_v4 = vpop.f32.mrb[2].mxu1  ;;  %v549_v23 = vpop.f32.mrb[2].mxu0  ;;  %v623_v43 = vrot.slane %v5156_v21, 4 }
  0xfb   :  { %v594_v9 = vadd.f32 %v593_v5, %v463_v3  ;;  %v468_v10 = vpop.f32.mrb[3].mxu1  ;;  %v550_v25 = vpop.f32.mrb[3].mxu0  ;;  %v618_v47 = vadd.f32 %v617_v41, %v5154_v19 }
  0xfc   :  { %v600_v13 = vadd.f32 %v599_v8, %v465_v7  ;;  %v624_v50 = vadd.f32 %v623_v43, %v5156_v21 }
  0xfd   :  { %v595_v14 = vrot.slane %v594_v9, 2  ;;  %v619_v58 = vrot.slane %v618_v47, 2 }
  0xfe   :  { %v601_v15 = vrot.slane %v600_v13, 2  ;;  %v625_v60 = vrot.slane %v624_v50, 2 }
  0xff   :  { %v596_v16 = vadd.f32 %v595_v14, %v594_v9  ;;  %v620_v0 = vadd.f32 %v619_v58, %v618_v47  ;;  %v753_v58 = vlaneseq }
 0x100   :  { %v602_v17 = vadd.f32 %v601_v15, %v600_v13  ;;  %v626_v2 = vadd.f32 %v625_v60, %v624_v50 }
 0x101   :  { %v597_v18 = vrot.slane %v596_v16, 1  ;;  %v621_v8 = vrot.slane %v620_v0, 1 }
 0x102   :  { %v603_v20 = vrot.slane %v602_v17, 1  ;;  %v627_v9 = vrot.slane %v626_v2, 1 }
 0x103   :  { %v598_v22 = vadd.f32 %v597_v18, %v596_v16  ;;  %v622_v16 = vadd.f32 %v621_v8, %v620_v0 }
 0x104   :  { %v604_v24 = vadd.f32 %v603_v20, %v602_v17  ;;  %v628_v18 = vadd.f32 %v627_v9, %v626_v2  ;;  %v5194_v2 = vshrl.u32 %v753_v58, 7 }
 0x105   :  { %v641_v26 = vmul.f32 0.125, %v598_v22 }
 0x106   :  { %v642_v27 = vmul.f32 0.125, %v604_v24  ;;  %v645_v24 = vmul.f32 0.125, %v622_v16 }
 0x107   :  { %v5158_v28 = vsub.f32 %v463_v3, %v641_v26  ;;  %v646_v26 = vmul.f32 0.125, %v628_v18 }
 0x108   :  { %v5160_v29 = vsub.f32 %v465_v7, %v642_v27 }
 0x109   :  { %v657_v30 = vmul.f32 %v5158_v28, %v5158_v28 }
 0x10a   :  { %v658_v31 = vmul.f32 %v5160_v29, %v5160_v29 }
 0x10b   :  { %v665_v32 = vrot.slane %v657_v30, 4 }
 0x10c   :  { %v671_v33 = vrot.slane %v658_v31, 4 }
 0x10d   :  { %v666_v34 = vadd.f32 %v665_v32, %v657_v30  ;;  %v5185_v32 = vsub.f32 %v5154_v19, %v645_v24 }
 0x10e   :  { %v672_v35 = vadd.f32 %v671_v33, %v658_v31 }
 0x10f   :  { %v667_v36 = vrot.slane %v666_v34, 2 }
 0x110   :  { %v673_v37 = vrot.slane %v672_v35, 2 }
 0x111   :  { %v668_v38 = vadd.f32 %v667_v36, %v666_v34  ;;  %v5188_v34 = vsub.f32 %v5156_v21, %v646_v26 }
 0x112   :  { %v674_v39 = vadd.f32 %v673_v37, %v672_v35 }
 0x113   :  { %v669_v40 = vrot.slane %v668_v38, 1 }
 0x114   :  { %v675_v42 = vrot.slane %v674_v39, 1 }
 0x115   :  { %v670_v44 = vadd.f32 %v669_v40, %v668_v38  ;;  %v661_v38 = vmul.f32 %v5185_v32, %v5185_v32  ;;  %v662_v40 = vmul.f32 %v5188_v34, %v5188_v34 }
 0x116   :  { %v676_v45 = vadd.f32 %v675_v42, %v674_v39 }
 0x117   :  { %v713_v46 = vmul.f32 0.125, %v670_v44  ;;  %v689_v44 = vrot.slane %v661_v38, 4 }
 0x118   :  { %v714_v48 = vmul.f32 0.125, %v676_v45  ;;  %v504_v49 = vpop.f32.mrb[4].mxu1  ;;  %v695_v45 = vrot.slane %v662_v40, 4 }
 0x119   :  { %v722_v51 = vadd.f32 1e-05, %v713_v46  ;;  %v605_v52 = vrot.slane %v504_v49, 4  ;;  %v506_v53 = vpop.f32.mrb[5].mxu1 }
 0x11a   :  { %v723_v6 = vadd.f32 1e-05, %v714_v48  ;;  %v611_v54 = vrot.slane %v506_v53, 4  ;;  %v508_v55 = vpop.f32.mrb[6].mxu1 }
 0x11b   :  { %4631 = vrsqrt.f32 %v722_v51  ;;  %v606_v56 = vadd.f32 %v605_v52, %v504_v49  ;;  %v509_v57 = vpop.f32.mrb[7].mxu1  ;;  %v690_v52 = vadd.f32 %v689_v44, %v661_v38 }
 0x11c   :  { %4633 = vrsqrt.f32 %v723_v6  ;;  %v612_v59 = vadd.f32 %v611_v54, %v506_v53  ;;  %v696_v54 = vadd.f32 %v695_v45, %v662_v40 }
 0x11d   :  { %v607_v61 = vrot.slane %v606_v56, 2 }
 0x11e   :  { %v613_v62 = vrot.slane %v612_v59, 2 }
 0x11f   :  { %v608_v63 = vadd.f32 %v607_v61, %v606_v56  ;;  %v4684_v56 = vmov 1966171168   ;;  %v691_v61 = vrot.slane %v690_v52, 2 }
 0x120   :  { %v614_v1 = vadd.f32 %v613_v62, %v612_v59  ;;  %v751_v57 = vunpack.c.l.s4 %v4684_v56 }
 0x121   :  { %v609_v3 = vrot.slane %v608_v63, 1 }
 0x122   :  { %v615_v5 = vrot.slane %v614_v1, 1 }
 0x123   :  { %v610_v7 = vadd.f32 %v609_v3, %v608_v63  ;;  %v697_v63 = vrot.slane %v696_v54, 2 }
 0x124   :  { %v616_v4 = vadd.f32 %v615_v5, %v614_v1  ;;  %v752_v1 = vunpack.c.0.s8 %v751_v57 }
 0x125   :  { %v5170_v10 = vpop.eup %4631  ;;  %v643_v11 = vmul.f32 0.125, %v610_v7  ;;  %v692_v7 = vadd.f32 %v691_v61, %v690_v52 }
 0x126   :  { %v5172_v12 = vpop.eup %4633  ;;  %v644_v13 = vmul.f32 0.125, %v616_v4  ;;  %v698_v4 = vadd.f32 %v697_v63, %v696_v54  ;;  %v846_v63 = vld [vmem:[%s6144_s3] sm:$0xff] }
 0x127   :  { %v746_v14 = vcombine.low %v5170_v10, %v5172_v12  ;;  %v5176_v15 = vsub.f32 %v504_v49, %v643_v11 }
 0x128   :  { %v5178_v17 = vsub.f32 %v506_v53, %v644_v13  ;;  %v5197_v13 = vsub.s32 %v752_v1, %v5194_v2  ;;  %v828_v1 = vsub.s32 7, %v5194_v2 }
 0x129   :  { %v659_v20 = vmul.f32 %v5176_v15, %v5176_v15 }
 0x12a   :  { %v660_v22 = vmul.f32 %v5178_v17, %v5178_v17 }
 0x12b   :  { %v677_v23 = vrot.slane %v659_v20, 4 }
 0x12c   :  { %v683_v25 = vrot.slane %v660_v22, 4 }
 0x12d   :  { %v678_v27 = vadd.f32 %v677_v23, %v659_v20  ;;  %v693_v23 = vrot.slane %v692_v7, 1 }
 0x12e   :  { %v684_v30 = vadd.f32 %v683_v25, %v660_v22  ;;  %v699_v25 = vrot.slane %v698_v4, 1 }
 0x12f   :  { %v679_v31 = vrot.slane %v678_v27, 2 }
 0x130   :  { %v685_v33 = vrot.slane %v684_v30, 2  ;;  %v700_v38 = vadd.f32 %v699_v25, %v698_v4  ;;  %v5233_v4 = vsub.s32 2, %v5194_v2 }
 0x131   :  { %v680_v35 = vadd.f32 %v679_v31, %v678_v27  ;;  %v756_v27 = vrot.slane %v746_v14, %v5197_v13 }
 0x132   :  { %v686_v36 = vadd.f32 %v685_v33, %v684_v30  ;;  %v718_v44 = vmul.f32 0.125, %v700_v38  ;;  %v859_v25 = vrot.slane %v846_v63, %v5233_v4 }
 0x133   :  { %v681_v37 = vrot.slane %v680_v35, 1 }
 0x134   :  { %v687_v39 = vrot.slane %v686_v36, 1 }
 0x135   :  { %v682_v41 = vadd.f32 %v681_v37, %v680_v35 }
 0x136   :  { %v688_v42 = vadd.f32 %v687_v39, %v686_v36  ;;  %v694_v36 = vadd.f32 %v693_v23, %v692_v7  ;;  %v5227_v7 = vsub.s32 0, %v5194_v2 }
 0x137   :  { %v715_v43 = vmul.f32 0.125, %v682_v41 }
 0x138   :  { %v716_v19 = vmul.f32 0.125, %v688_v42  ;;  %v586_v46 = vpop.f32.mrb[8].mxu1  ;;  %v717_v42 = vmul.f32 0.125, %v694_v36 }
 0x139   :  { %v724_v47 = vadd.f32 1e-05, %v715_v43  ;;  %v629_v21 = vrot.slane %v586_v46, 4  ;;  %v588_v48 = vpop.f32.mrb[9].mxu1 }
 0x13a   :  { %v725_v49 = vadd.f32 1e-05, %v716_v19  ;;  %v635_v50 = vrot.slane %v588_v48, 4  ;;  %v590_v51 = vpop.f32.mrb[10].mxu1  ;;  %v726_v19 = vadd.f32 1e-05, %v717_v42 }
 0x13b   :  { %4635 = vrsqrt.f32 %v724_v47  ;;  %v630_v53 = vadd.f32 %v629_v21, %v586_v46  ;;  %v591_v6 = vpop.f32.mrb[11].mxu1 }
 0x13c   :  { %4637 = vrsqrt.f32 %v725_v49  ;;  %v636_v55 = vadd.f32 %v635_v50, %v588_v48 }
 0x13d   :  { %v631_v59 = vrot.slane %v630_v53, 2  ;;  %4639 = vrsqrt.f32 %v726_v19 }
 0x13e   :  { %v637_v60 = vrot.slane %v636_v55, 2 }
 0x13f   :  { %v632_v62 = vadd.f32 %v631_v59, %v630_v53 }
 0x140   :  { %v638_v0 = vadd.f32 %v637_v60, %v636_v55 }
 0x141   :  { %v633_v3 = vrot.slane %v632_v62, 1 }
 0x142   :  { %v639_v5 = vrot.slane %v638_v0, 1 }
 0x143   :  { %v634_v8 = vadd.f32 %v633_v3, %v632_v62  ;;  %v5224_v3 = vsub.s32 1, %v5194_v2 }
 0x144   :  { %v640_v9 = vadd.f32 %v639_v5, %v638_v0  ;;  %v721_v0 = vld [vmem:[%s6143_s2] sm:$0xff] }
 0x145   :  { %v4636_v11 = vpop.eup %4635  ;;  %v647_v16 = vmul.f32 0.125, %v634_v8  ;;  %v5230_v8 = vsub.s32 3, %v5194_v2 }
 0x146   :  { %v4638_v18 = vpop.eup %4637  ;;  %v648_v20 = vmul.f32 0.125, %v640_v9  ;;  %v855_v9 = vrot.slane %v846_v63, %v5224_v3 }
 0x147   :  { %v747_v22 = vcombine.low %v4636_v11, %v4638_v18  ;;  %v5199_v24 = vsub.f32 %v586_v46, %v647_v16  ;;  %v727_v46 = vadd.f32 1e-05, %v718_v44  ;;  %v4640_v53 = vpop.eup %4639  ;;  %v820_v11 = vsub.s32 5, %v5194_v2 }
 0x148   :  { %v5201_v26 = vsub.f32 %v588_v48, %v648_v20  ;;  %v816_v16 = vsub.s32 4, %v5194_v2  ;;  %v824_v18 = vsub.s32 6, %v5194_v2  ;;  %v863_v23 = vrot.slane %v846_v63, %v5230_v8 }
 0x149   :  { %v763_v30 = vrot.slane %v747_v22, %v5197_v13  ;;  %v663_v31 = vmul.f32 %v5199_v24, %v5199_v24  ;;  %4641 = vrsqrt.f32 %v727_v46  ;;  %v851_v22 = vrot.slane %v846_v63, %v5227_v7 }
 0x14a   :  { %v664_v33 = vmul.f32 %v5201_v26, %v5201_v26 }
 0x14b   :  { %v778_v35 = vcombine.low %v756_v27, %v763_v30  ;;  %v701_v37 = vrot.slane %v663_v31, 4  ;;  %v871_v27 = vrot.slane %v846_v63, %v820_v11  ;;  %v867_v30 = vrot.slane %v846_v63, %v816_v16 }
 0x14c   :  { %v707_v39 = vrot.slane %v664_v33, 4 }
 0x14d   :  { %v702_v40 = vadd.f32 %v701_v37, %v663_v31  ;;  %v786_v61 = vrot.slane %v778_v35, %v5197_v13  ;;  %v879_v31 = vrot.slane %v846_v63, %v828_v1 }
 0x14e   :  { %v708_v41 = vadd.f32 %v707_v39, %v664_v33  ;;  %v875_v33 = vrot.slane %v846_v63, %v824_v18  ;;  %v4252_v63 = vld [vmem:[%s6145_s4 + $0x268] ss:$16 sps:$4 sm:$0xff]  }
 0x14f   :  { %v703_v43 = vrot.slane %v702_v40, 2 }
 0x150   :  { %v709_v10 = vrot.slane %v708_v41, 2 }
 0x151   :  { %v704_v12 = vadd.f32 %v703_v43, %v702_v40 }
 0x152   :  { %v710_v14 = vadd.f32 %v709_v10, %v708_v41 }
 0x153   :  { %v705_v45 = vrot.slane %v704_v12, 1  ;;  %v4642_v6 = vpop.eup %4641 }
 0x154   :  { %v711_v47 = vrot.slane %v710_v14, 1  ;;  %v748_v55 = vcombine.low %v4640_v53, %v4642_v6  ;;  %v4242_v53 = vld [vmem:[%s6145_s4 + $0x22c] ss:$16 sps:$4 sm:$0xff]  }
 0x155   :  { %v706_v21 = vadd.f32 %v705_v45, %v704_v12 }
 0x156   :  { %v712_v48 = vadd.f32 %v711_v47, %v710_v14  ;;  %v770_v58 = vrot.slane %v748_v55, %v5197_v13  ;;  %v4240_v55 = vld [vmem:[%s6145_s4 + $0x228] ss:$16 sps:$4 sm:$0xff]  }
 0x157   :  { %v719_v49 = vmul.f32 0.125, %v706_v21 }
 0x158   :  { %v720_v50 = vmul.f32 0.125, %v712_v48 }
 0x159   :  { %v728_v51 = vadd.f32 1e-05, %v719_v49 }
 0x15a   :  { %v729_v52 = vadd.f32 1e-05, %v720_v50 }
 0x15b   :  { %4643 = vrsqrt.f32 %v728_v51 }
 0x15c   :  { %4645 = vrsqrt.f32 %v729_v52  ;;  %v4239_v52 = vld [vmem:[%s6145_s4 + $0x224] ss:$16 sps:$4 sm:$0xff]  }
 0x165   :  { %v4644_v54 = vpop.eup %4643 }
 0x166   :  { %v4646_v56 = vpop.eup %4645 }
 0x167   :  { %v749_v57 = vcombine.low %v4644_v54, %v4646_v56  ;;  %v4237_v54 = vld [vmem:[%s6145_s4 + $0x220] ss:$16 sps:$4 sm:$0xff]   ;;  %v4245_v56 = vld [vmem:[%s6145_s4 + $0x244] ss:$16 sps:$4 sm:$0xff]  }
 0x169   :  { %v777_v59 = vrot.slane %v749_v57, %v5197_v13  ;;  %v4248_v57 = vld [vmem:[%s6145_s4 + $0x24c] ss:$16 sps:$4 sm:$0xff]  }
 0x16b   :  { %v779_v60 = vcombine.low %v770_v58, %v777_v59  ;;  %v4243_v58 = vld [vmem:[%s6145_s4 + $0x240] ss:$16 sps:$4 sm:$0xff]   ;;  %v4246_v59 = vld [vmem:[%s6145_s4 + $0x248] ss:$16 sps:$4 sm:$0xff]  }
 0x16d   :  { %v793_v62 = vrot.slane %v779_v60, %v5197_v13  ;;  %v4251_v60 = vld [vmem:[%s6145_s4 + $0x264] ss:$16 sps:$4 sm:$0xff]  }
 0x16f   :  { %v794_v5 = vcombine.low %v786_v61, %v793_v62  ;;  %v4254_v61 = vld [vmem:[%s6145_s4 + $0x26c] ss:$16 sps:$4 sm:$0xff]   ;;  %v4249_v62 = vld [vmem:[%s6145_s4 + $0x260] ss:$16 sps:$4 sm:$0xff]  }
 0x171   :  { %v796_v20 = vmul.f32 %v794_v5, %v721_v0  ;;  %v4257_v0 = vld [vmem:[%s6145_s4 + $0x284] ss:$16 sps:$4 sm:$0xff]   ;;  %v4255_v5 = vld [vmem:[%s6145_s4 + $0x280] ss:$16 sps:$4 sm:$0xff]  }
 0x173   :  { %v829_v35 = vrot.slane %v796_v20, %v828_v1  ;;  %v805_v36 = vrot.slane %v796_v20, %v5224_v3  ;;  %v801_v37 = vrot.slane %v796_v20, %v5227_v7  ;;  %v813_v38 = vrot.slane %v796_v20, %v5230_v8  ;;  %v4260_v1 = vld [vmem:[%s6145_s4 + $0x28c] ss:$16 sps:$4 sm:$0xff]  }
 0x174   :  { %v809_v2 = vrot.slane %v796_v20, %v5233_v4  ;;  %v821_v39 = vrot.slane %v796_v20, %v820_v11  ;;  %v817_v40 = vrot.slane %v796_v20, %v816_v16  ;;  %v825_v41 = vrot.slane %v796_v20, %v824_v18  ;;  %v4263_v11 = vld [vmem:[%s6145_s4 + $0x2a4] ss:$16 sps:$4 sm:$0xff]   ;;  %v4266_v16 = vld [vmem:[%s6145_s4 + $0x2ac] ss:$16 sps:$4 sm:$0xff]   ;;  %v4261_v18 = vld [vmem:[%s6145_s4 + $0x2a0] ss:$16 sps:$4 sm:$0xff]  }
 0x175   :  { %v845_v42 = vmul.f32 %v829_v35, %v5201_v26  ;;  %v839_v43 = vmul.f32 %v805_v36, %v5160_v29  ;;  %v838_v44 = vmul.f32 %v801_v37, %v5158_v28  ;;  %v841_v10 = vmul.f32 %v813_v38, %v5178_v17  ;;  %v4264_v20 = vld [vmem:[%s6145_s4 + $0x2a8] ss:$16 sps:$4 sm:$0xff]   ;;  %v4281_v36 = vld [vmem:[%s6145_s4 + $0x304] ss:$16 sps:$4 sm:$0xff]   ;;  %v4284_v37 = vld [vmem:[%s6145_s4 + $0x30c] ss:$16 sps:$4 sm:$0xff]  }
 0x176   :  { %v840_v12 = vmul.f32 %v809_v2, %v5176_v15  ;;  %v843_v14 = vmul.f32 %v821_v39, %v5188_v34  ;;  %v842_v19 = vmul.f32 %v817_v40, %v5185_v32  ;;  %v844_v45 = vmul.f32 %v825_v41, %v5199_v24  ;;  %v4231_v32 = vld [vmem:[%s6145_s4 + $0x200] ss:$16 sps:$4 sm:$0xff]   ;;  %v4234_v24 = vld [vmem:[%s6145_s4 + $0x208] ss:$16 sps:$4 sm:$0xff]   ;;  %v4287_v39 = vld [vmem:[%s6145_s4 + $0x324] ss:$16 sps:$4 sm:$0xff]  }
 0x177   :  { %v889_v46 = vadd.f32 %v855_v9, %v839_v43  ;;  %v888_v47 = vadd.f32 %v851_v22, %v838_v44  ;;  %v891_v21 = vadd.f32 %v863_v23, %v841_v10  ;;  %v5254_v48 = vadd.f32 %v879_v31, %v845_v42  ;;  %v4258_v9 = vld [vmem:[%s6145_s4 + $0x288] ss:$16 sps:$4 sm:$0xff]   ;;  %v4269_v22 = vld [vmem:[%s6145_s4 + $0x2c4] ss:$16 sps:$4 sm:$0xff]   ;;  %v4272_v23 = vld [vmem:[%s6145_s4 + $0x2cc] ss:$16 sps:$4 sm:$0xff]  }
 0x178   :  { %v5256_v26 = vadd.f32 %v859_v25, %v840_v12  ;;  %v5258_v29 = vadd.f32 %v871_v27, %v843_v14  ;;  %v5260_v28 = vadd.f32 %v867_v30, %v842_v19  ;;  %v5262_v17 = vadd.f32 %v875_v33, %v844_v45  ;;  %v4267_v25 = vld [vmem:[%s6145_s4 + $0x2c0] ss:$16 sps:$4 sm:$0xff]   ;;  %v4270_v27 = vld [vmem:[%s6145_s4 + $0x2c8] ss:$16 sps:$4 sm:$0xff]   ;;  %v4275_v30 = vld [vmem:[%s6145_s4 + $0x2e4] ss:$16 sps:$4 sm:$0xff]  }
 0x179   :  { %v897_v15 = vmax.f32 %v889_v46, 0.0  ;;  %v896_v49 = vmax.f32 %v888_v47, 0.0  ;;  %v899_v34 = vmax.f32 %v891_v21, 0.0  ;;  %v4278_v31 = vld [vmem:[%s6145_s4 + $0x2ec] ss:$16 sps:$4 sm:$0xff]  }
 0x17a   :  { %v4273_v33 = vld [vmem:[%s6145_s4 + $0x2e0] ss:$16 sps:$4 sm:$0xff]   ;;  %v4276_v35 = vld [vmem:[%s6145_s4 + $0x2e8] ss:$16 sps:$4 sm:$0xff]   ;;  %v4290_v40 = vld [vmem:[%s6145_s4 + $0x32c] ss:$16 sps:$4 sm:$0xff]  }
 0x17b   :  { %v905_v50 = vpack.c.bf16 %v897_v15, %v897_v15  ;;  %v904_v51 = vpack.c.bf16 %v896_v49, %v896_v49  ;;  %v907_v6 = vpack.c.bf16 %v899_v34, %v899_v34  ;;  %v4279_v38 = vld [vmem:[%s6145_s4 + $0x300] ss:$16 sps:$4 sm:$0xff]   ;;  %v4282_v2 = vld [vmem:[%s6145_s4 + $0x308] ss:$16 sps:$4 sm:$0xff]   ;;  %v4293_v43 = vld [vmem:[%s6145_s4 + $0x344] ss:$16 sps:$4 sm:$0xff]  }
 0x17c   :  { %v4285_v41 = vld [vmem:[%s6145_s4 + $0x320] ss:$16 sps:$4 sm:$0xff]   ;;  %v4288_v42 = vld [vmem:[%s6145_s4 + $0x328] ss:$16 sps:$4 sm:$0xff]   ;;  %v4296_v44 = vld [vmem:[%s6145_s4 + $0x34c] ss:$16 sps:$4 sm:$0xff]  }
 0x17d   :  { %2480 = vmatprep.mubr.bf16.mxu0 %v905_v50  ;;  %2644 = vmatprep.mubr.bf16.mxu1 %v905_v50  ;;  %v4291_v10 = vld [vmem:[%s6145_s4 + $0x340] ss:$16 sps:$4 sm:$0xff]   ;;  %v4294_v12 = vld [vmem:[%s6145_s4 + $0x348] ss:$16 sps:$4 sm:$0xff]   ;;  %v4299_v14 = vld [vmem:[%s6145_s4 + $0x364] ss:$16 sps:$4 sm:$0xff]  }
 0x17e   :  { %2481 = vmatmul.mubr.bf16.vlgmr.msra.gmra.mrb[4].mxu0 %v904_v51  ;;  %2645 = vmatmul.mubr.bf16.vlgmr.msra.gmra.mrb[12].mxu1 %v904_v51  ;;  %v4302_v19 = vld [vmem:[%s6145_s4 + $0x36c] ss:$16 sps:$4 sm:$0xff]   ;;  %v4297_v45 = vld [vmem:[%s6145_s4 + $0x360] ss:$16 sps:$4 sm:$0xff]   ;;  %v4300_v46 = vld [vmem:[%s6145_s4 + $0x368] ss:$16 sps:$4 sm:$0xff]  }
 0x17f   :  { %2490 = vmatpush1.bf16.msra.mxu0 %v4231_v32  ;;  %2654 = vmatpush1.bf16.msra.mxu1 %v4234_v24  ;;  %v4305_v47 = vld [vmem:[%s6145_s4 + $0x384] ss:$16 sps:$4 sm:$0xff]   ;;  %v4308_v21 = vld [vmem:[%s6145_s4 + $0x38c] ss:$16 sps:$4 sm:$0xff]   ;;  %v4303_v15 = vld [vmem:[%s6145_s4 + $0x380] ss:$16 sps:$4 sm:$0xff]  }
 0x180   :  { %2521 = vmatprep.mubr.bf16.mxu0 %v907_v6  ;;  %2685 = vmatprep.mubr.bf16.mxu1 %v907_v6  ;;  %v4306_v49 = vld [vmem:[%s6145_s4 + $0x388] ss:$16 sps:$4 sm:$0xff]   ;;  %v4311_v34 = vld [vmem:[%s6145_s4 + $0x3a4] ss:$16 sps:$4 sm:$0xff]   ;;  %v4314_v50 = vld [vmem:[%s6145_s4 + $0x3ac] ss:$16 sps:$4 sm:$0xff]  }
 0x181   :  { %2491 = vmatprep.subr.bf16.mxu0 %v4239_v52  ;;  %2655 = vmatprep.subr.bf16.mxu1 %v4242_v53  ;;  %v4309_v32 = vld [vmem:[%s6145_s4 + $0x3a0] ss:$16 sps:$4 sm:$0xff]   ;;  %v4312_v24 = vld [vmem:[%s6145_s4 + $0x3a8] ss:$16 sps:$4 sm:$0xff]   ;;  %v4317_v51 = vld [vmem:[%s6145_s4 + $0x3c4] ss:$16 sps:$4 sm:$0xff]  }
 0x182   :  { %v4320_v52 = vld [vmem:[%s6145_s4 + $0x3cc] ss:$16 sps:$4 sm:$0xff]   ;;  %v4315_v53 = vld [vmem:[%s6145_s4 + $0x3c0] ss:$16 sps:$4 sm:$0xff]   ;;  %v4318_v6 = vld [vmem:[%s6145_s4 + $0x3c8] ss:$16 sps:$4 sm:$0xff]  }
 0x183   :  { %2492 = vmatpush1.bf16.msra.mxu0 %v4237_v54  ;;  %2656 = vmatpush1.bf16.msra.mxu1 %v4240_v55  ;;  %v4323_v54 = vld [vmem:[%s6145_s4 + $0x3e4] ss:$16 sps:$4 sm:$0xff]   ;;  %v4326_v55 = vld [vmem:[%s6145_s4 + $0x3ec] ss:$16 sps:$4 sm:$0xff]  }
 0x184   :  { %2493 = vmatprep.subr.bf16.mxu0 %v4245_v56  ;;  %2657 = vmatprep.subr.bf16.mxu1 %v4248_v57  ;;  %v4321_v56 = vld [vmem:[%s6145_s4 + $0x3e0] ss:$16 sps:$4 sm:$0xff]   ;;  %v4324_v57 = vld [vmem:[%s6145_s4 + $0x3e8] ss:$16 sps:$4 sm:$0xff]  }
 0x187   :  { %2494 = vmatpush1.bf16.msra.mxu0 %v4243_v58  ;;  %2658 = vmatpush1.bf16.msra.mxu1 %v4246_v59  ;;  %v898_v58 = vmax.f32 %v5256_v26, 0.0  ;;  %v4329_v59 = vld [vmem:[%s6145_s4 + $0x404] ss:$16 sps:$4 sm:$0xff]   ;;  %v4330_v26 = vld [vmem:[%s6145_s4 + $0x408] ss:$16 sps:$4 sm:$0xff]  }
 0x188   :  { %2495 = vmatprep.subr.bf16.mxu0 %v4251_v60  ;;  %2659 = vmatprep.subr.bf16.mxu1 %v4254_v61  ;;  %v4332_v60 = vld [vmem:[%s6145_s4 + $0x40c] ss:$16 sps:$4 sm:$0xff]   ;;  %v901_v61 = vmax.f32 %v5258_v29, 0.0 }
 0x189   :  { %v4338_v29 = vld [vmem:[%s6145_s4 + $0x42c] ss:$16 sps:$4 sm:$0xff]  }
 0x18b   :  { %2496 = vmatpush1.bf16.msra.mxu0 %v4249_v62  ;;  %2660 = vmatpush1.bf16.msra.mxu1 %v4252_v63  ;;  %v4327_v62 = vld [vmem:[%s6145_s4 + $0x400] ss:$16 sps:$4 sm:$0xff]   ;;  %v906_v63 = vpack.c.bf16 %v898_v58, %v898_v58  ;;  %v4407_v58 = vld [vmem:[%s6145_s4 + $0x5a4] ss:$16 sps:$4 sm:$0xff]  }
 0x18c   :  { %2497 = vmatprep.subr.bf16.mxu0 %v4257_v0  ;;  %2661 = vmatprep.subr.bf16.mxu1 %v4260_v1  ;;  %v909_v0 = vpack.c.bf16 %v901_v61, %v901_v61  ;;  %v4335_v1 = vld [vmem:[%s6145_s4 + $0x424] ss:$16 sps:$4 sm:$0xff]   ;;  %v4408_v61 = vld [vmem:[%s6145_s4 + $0x5a8] ss:$16 sps:$4 sm:$0xff]  }
 0x18f   :  { %2498 = vmatpush1.bf16.msra.mxu0 %v4255_v5  ;;  %2662 = vmatpush1.bf16.msra.mxu1 %v4258_v9  ;;  %v4333_v5 = vld [vmem:[%s6145_s4 + $0x420] ss:$16 sps:$4 sm:$0xff]   ;;  %v4336_v9 = vld [vmem:[%s6145_s4 + $0x428] ss:$16 sps:$4 sm:$0xff]  }
 0x190   :  { %2499 = vmatprep.subr.bf16.mxu0 %v4263_v11  ;;  %2663 = vmatprep.subr.bf16.mxu1 %v4266_v16  ;;  %v4341_v11 = vld [vmem:[%s6145_s4 + $0x444] ss:$16 sps:$4 sm:$0xff]   ;;  %v4344_v16 = vld [vmem:[%s6145_s4 + $0x44c] ss:$16 sps:$4 sm:$0xff]  }
 0x193   :  { %2500 = vmatpush1.bf16.msra.mxu0 %v4261_v18  ;;  %2664 = vmatpush1.bf16.msra.mxu1 %v4264_v20  ;;  %v4339_v18 = vld [vmem:[%s6145_s4 + $0x440] ss:$16 sps:$4 sm:$0xff]   ;;  %v4342_v20 = vld [vmem:[%s6145_s4 + $0x448] ss:$16 sps:$4 sm:$0xff]  }
 0x194   :  { %2501 = vmatprep.subr.bf16.mxu0 %v4269_v22  ;;  %2665 = vmatprep.subr.bf16.mxu1 %v4272_v23  ;;  %v4347_v22 = vld [vmem:[%s6145_s4 + $0x464] ss:$16 sps:$4 sm:$0xff]   ;;  %v4350_v23 = vld [vmem:[%s6145_s4 + $0x46c] ss:$16 sps:$4 sm:$0xff]  }
 0x197   :  { %2502 = vmatpush1.bf16.msra.mxu0 %v4267_v25  ;;  %2666 = vmatpush1.bf16.msra.mxu1 %v4270_v27  ;;  %v4345_v25 = vld [vmem:[%s6145_s4 + $0x460] ss:$16 sps:$4 sm:$0xff]   ;;  %v4348_v27 = vld [vmem:[%s6145_s4 + $0x468] ss:$16 sps:$4 sm:$0xff]  }
 0x198   :  { %2503 = vmatprep.subr.bf16.mxu0 %v4275_v30  ;;  %2667 = vmatprep.subr.bf16.mxu1 %v4278_v31  ;;  %v4353_v30 = vld [vmem:[%s6145_s4 + $0x484] ss:$16 sps:$4 sm:$0xff]   ;;  %v4356_v31 = vld [vmem:[%s6145_s4 + $0x48c] ss:$16 sps:$4 sm:$0xff]  }
 0x19b   :  { %2504 = vmatpush1.bf16.msra.mxu0 %v4273_v33  ;;  %2668 = vmatpush1.bf16.msra.mxu1 %v4276_v35  ;;  %v4351_v33 = vld [vmem:[%s6145_s4 + $0x480] ss:$16 sps:$4 sm:$0xff]   ;;  %v4354_v35 = vld [vmem:[%s6145_s4 + $0x488] ss:$16 sps:$4 sm:$0xff]  }
 0x19c   :  { %2505 = vmatprep.subr.bf16.mxu0 %v4281_v36  ;;  %2669 = vmatprep.subr.bf16.mxu1 %v4284_v37  ;;  %v4359_v36 = vld [vmem:[%s6145_s4 + $0x4a4] ss:$16 sps:$4 sm:$0xff]   ;;  %v4362_v37 = vld [vmem:[%s6145_s4 + $0x4ac] ss:$16 sps:$4 sm:$0xff]  }
 0x19f   :  { %2506 = vmatpush1.bf16.msra.mxu0 %v4279_v38  ;;  %2670 = vmatpush1.bf16.msra.mxu1 %v4282_v2  ;;  %v4357_v38 = vld [vmem:[%s6145_s4 + $0x4a0] ss:$16 sps:$4 sm:$0xff]   ;;  %v4360_v2 = vld [vmem:[%s6145_s4 + $0x4a8] ss:$16 sps:$4 sm:$0xff]  }
 0x1a0   :  { %2507 = vmatprep.subr.bf16.mxu0 %v4287_v39  ;;  %2671 = vmatprep.subr.bf16.mxu1 %v4290_v40  ;;  %v4365_v39 = vld [vmem:[%s6145_s4 + $0x4c4] ss:$16 sps:$4 sm:$0xff]   ;;  %v4368_v40 = vld [vmem:[%s6145_s4 + $0x4cc] ss:$16 sps:$4 sm:$0xff]  }
 0x1a3   :  { %2508 = vmatpush1.bf16.msra.mxu0 %v4285_v41  ;;  %2672 = vmatpush1.bf16.msra.mxu1 %v4288_v42  ;;  %v4363_v41 = vld [vmem:[%s6145_s4 + $0x4c0] ss:$16 sps:$4 sm:$0xff]   ;;  %v4366_v42 = vld [vmem:[%s6145_s4 + $0x4c8] ss:$16 sps:$4 sm:$0xff]  }
 0x1a4   :  { %2509 = vmatprep.subr.bf16.mxu0 %v4293_v43  ;;  %2673 = vmatprep.subr.bf16.mxu1 %v4296_v44  ;;  %v4371_v43 = vld [vmem:[%s6145_s4 + $0x4e4] ss:$16 sps:$4 sm:$0xff]   ;;  %v4374_v44 = vld [vmem:[%s6145_s4 + $0x4ec] ss:$16 sps:$4 sm:$0xff]  }
 0x1a7   :  { %2510 = vmatpush1.bf16.msra.mxu0 %v4291_v10  ;;  %2674 = vmatpush1.bf16.msra.mxu1 %v4294_v12  ;;  %v4369_v10 = vld [vmem:[%s6145_s4 + $0x4e0] ss:$16 sps:$4 sm:$0xff]   ;;  %v4372_v12 = vld [vmem:[%s6145_s4 + $0x4e8] ss:$16 sps:$4 sm:$0xff]  }
 0x1a8   :  { %2511 = vmatprep.subr.bf16.mxu0 %v4299_v14  ;;  %2675 = vmatprep.subr.bf16.mxu1 %v4302_v19  ;;  %v4377_v14 = vld [vmem:[%s6145_s4 + $0x504] ss:$16 sps:$4 sm:$0xff]   ;;  %v4380_v19 = vld [vmem:[%s6145_s4 + $0x50c] ss:$16 sps:$4 sm:$0xff]  }
 0x1ab   :  { %2512 = vmatpush1.bf16.msra.mxu0 %v4297_v45  ;;  %2676 = vmatpush1.bf16.msra.mxu1 %v4300_v46  ;;  %v4375_v45 = vld [vmem:[%s6145_s4 + $0x500] ss:$16 sps:$4 sm:$0xff]   ;;  %v4378_v46 = vld [vmem:[%s6145_s4 + $0x508] ss:$16 sps:$4 sm:$0xff]  }
 0x1ac   :  { %2513 = vmatprep.subr.bf16.mxu0 %v4305_v47  ;;  %2677 = vmatprep.subr.bf16.mxu1 %v4308_v21  ;;  %v4383_v47 = vld [vmem:[%s6145_s4 + $0x524] ss:$16 sps:$4 sm:$0xff]   ;;  %v4386_v21 = vld [vmem:[%s6145_s4 + $0x52c] ss:$16 sps:$4 sm:$0xff]  }
 0x1af   :  { %2514 = vmatpush1.bf16.msra.mxu0 %v4303_v15  ;;  %2678 = vmatpush1.bf16.msra.mxu1 %v4306_v49  ;;  %v4381_v15 = vld [vmem:[%s6145_s4 + $0x520] ss:$16 sps:$4 sm:$0xff]   ;;  %v4384_v49 = vld [vmem:[%s6145_s4 + $0x528] ss:$16 sps:$4 sm:$0xff]  }
 0x1b0   :  { %2515 = vmatprep.subr.bf16.mxu0 %v4311_v34  ;;  %2679 = vmatprep.subr.bf16.mxu1 %v4314_v50  ;;  %v4389_v34 = vld [vmem:[%s6145_s4 + $0x544] ss:$16 sps:$4 sm:$0xff]   ;;  %v4392_v50 = vld [vmem:[%s6145_s4 + $0x54c] ss:$16 sps:$4 sm:$0xff]  }
 0x1b3   :  { %2516 = vmatpush1.bf16.msra.mxu0 %v4309_v32  ;;  %2680 = vmatpush1.bf16.msra.mxu1 %v4312_v24  ;;  %v4387_v32 = vld [vmem:[%s6145_s4 + $0x540] ss:$16 sps:$4 sm:$0xff]   ;;  %v4390_v24 = vld [vmem:[%s6145_s4 + $0x548] ss:$16 sps:$4 sm:$0xff]  }
 0x1b4   :  { %2517 = vmatprep.subr.bf16.mxu0 %v4317_v51  ;;  %2681 = vmatprep.subr.bf16.mxu1 %v4320_v52  ;;  %v4395_v51 = vld [vmem:[%s6145_s4 + $0x564] ss:$16 sps:$4 sm:$0xff]   ;;  %v4398_v52 = vld [vmem:[%s6145_s4 + $0x56c] ss:$16 sps:$4 sm:$0xff]  }
 0x1b7   :  { %2518 = vmatpush1.bf16.msra.mxu0 %v4315_v53  ;;  %2682 = vmatpush1.bf16.msra.mxu1 %v4318_v6  ;;  %v4393_v53 = vld [vmem:[%s6145_s4 + $0x560] ss:$16 sps:$4 sm:$0xff]   ;;  %v4396_v6 = vld [vmem:[%s6145_s4 + $0x568] ss:$16 sps:$4 sm:$0xff]  }
 0x1b8   :  { %2519 = vmatprep.subr.bf16.mxu0 %v4323_v54  ;;  %2683 = vmatprep.subr.bf16.mxu1 %v4326_v55  ;;  %v4401_v54 = vld [vmem:[%s6145_s4 + $0x584] ss:$16 sps:$4 sm:$0xff]   ;;  %v4404_v55 = vld [vmem:[%s6145_s4 + $0x58c] ss:$16 sps:$4 sm:$0xff]  }
 0x1bb   :  { %2520 = vmatpush1.bf16.msra.mxu0 %v4321_v56  ;;  %2684 = vmatpush1.bf16.msra.mxu1 %v4324_v57  ;;  %v4399_v56 = vld [vmem:[%s6145_s4 + $0x580] ss:$16 sps:$4 sm:$0xff]   ;;  %v4402_v57 = vld [vmem:[%s6145_s4 + $0x588] ss:$16 sps:$4 sm:$0xff]  }
 0x1bc   :  { %2530 = vmatprep.subr.bf16.mxu0 %v4329_v59  ;;  %2694 = vmatprep.subr.bf16.mxu1 %v4332_v60  ;;  %v4410_v59 = vld [vmem:[%s6145_s4 + $0x5ac] ss:$16 sps:$4 sm:$0xff]   ;;  %v4405_v60 = vld [vmem:[%s6145_s4 + $0x5a0] ss:$16 sps:$4 sm:$0xff]  }
 0x1be   :  { %2522 = vmatmul.mubr.bf16.vlgmr.msra.gmra.mrb[4].mxu0 %v906_v63  ;;  %2686 = vmatmul.mubr.bf16.vlgmr.msra.gmra.mrb[12].mxu1 %v906_v63  ;;  %v4416_v63 = vld [vmem:[%s6145_s4 + $0x5cc] ss:$16 sps:$4 sm:$0xff]  }
 0x1bf   :  { %2531 = vmatpush1.bf16.msra.mxu0 %v4327_v62  ;;  %2562 = vmatprep.mubr.bf16.mxu0 %v909_v0  ;;  %v4413_v62 = vld [vmem:[%s6145_s4 + $0x5c4] ss:$16 sps:$4 sm:$0xff]  }
 0x1c0   :  { %2695 = vmatpush1.bf16.msra.mxu1 %v4330_v26  ;;  %2726 = vmatprep.mubr.bf16.mxu1 %v909_v0  ;;  %v4411_v26 = vld [vmem:[%s6145_s4 + $0x5c0] ss:$16 sps:$4 sm:$0xff]   ;;  %v4414_v0 = vld [vmem:[%s6145_s4 + $0x5c8] ss:$16 sps:$4 sm:$0xff]  }
 0x1c1   :  { %2532 = vmatprep.subr.bf16.mxu0 %v4335_v1  ;;  %2696 = vmatprep.subr.bf16.mxu1 %v4338_v29  ;;  %v4419_v1 = vld [vmem:[%s6145_s4 + $0x5e4] ss:$16 sps:$4 sm:$0xff]   ;;  %v4422_v29 = vld [vmem:[%s6145_s4 + $0x5ec] ss:$16 sps:$4 sm:$0xff]  }
 0x1c3   :  { %2533 = vmatpush1.bf16.msra.mxu0 %v4333_v5  ;;  %v4417_v5 = vld [vmem:[%s6145_s4 + $0x5e0] ss:$16 sps:$4 sm:$0xff]  }
 0x1c4   :  { %2697 = vmatpush1.bf16.msra.mxu1 %v4336_v9  ;;  %2534 = vmatprep.subr.bf16.mxu0 %v4341_v11  ;;  %v4420_v9 = vld [vmem:[%s6145_s4 + $0x5e8] ss:$16 sps:$4 sm:$0xff]   ;;  %v900_v11 = vmax.f32 %v5260_v28, 0.0 }
 0x1c5   :  { %2698 = vmatprep.subr.bf16.mxu1 %v4344_v16  ;;  %v4425_v16 = vld [vmem:[%s6145_s4 + $0x604] ss:$16 sps:$4 sm:$0xff]   ;;  %v4426_v28 = vld [vmem:[%s6145_s4 + $0x608] ss:$16 sps:$4 sm:$0xff]  }
 0x1c7   :  { %2535 = vmatpush1.bf16.msra.mxu0 %v4339_v18  ;;  %v4428_v18 = vld [vmem:[%s6145_s4 + $0x60c] ss:$16 sps:$4 sm:$0xff]  }
 0x1c8   :  { %2699 = vmatpush1.bf16.msra.mxu1 %v4342_v20  ;;  %2536 = vmatprep.subr.bf16.mxu0 %v4347_v22  ;;  %v903_v20 = vmax.f32 %v5254_v48, 0.0  ;;  %v4423_v22 = vld [vmem:[%s6145_s4 + $0x600] ss:$16 sps:$4 sm:$0xff]   ;;  %v4434_v48 = vld [vmem:[%s6145_s4 + $0x62c] ss:$16 sps:$4 sm:$0xff]  }
 0x1c9   :  { %2700 = vmatprep.subr.bf16.mxu1 %v4350_v23  ;;  %v908_v23 = vpack.c.bf16 %v900_v11, %v900_v11  ;;  %v4501_v11 = vld [vmem:[%s6145_s4 + $0x7a0] ss:$16 sps:$4 sm:$0xff]  }
 0x1cb   :  { %2537 = vmatpush1.bf16.msra.mxu0 %v4345_v25  ;;  %v4431_v25 = vld [vmem:[%s6145_s4 + $0x624] ss:$16 sps:$4 sm:$0xff]  }
 0x1cc   :  { %2701 = vmatpush1.bf16.msra.mxu1 %v4348_v27  ;;  %2538 = vmatprep.subr.bf16.mxu0 %v4353_v30  ;;  %v911_v27 = vpack.c.bf16 %v903_v20, %v903_v20  ;;  %v4429_v30 = vld [vmem:[%s6145_s4 + $0x620] ss:$16 sps:$4 sm:$0xff]   ;;  %v4512_v20 = vld [vmem:[%s6145_s4 + $0x7cc] ss:$16 sps:$4 sm:$0xff]  }
 0x1cd   :  { %2702 = vmatprep.subr.bf16.mxu1 %v4356_v31  ;;  %v4432_v31 = vld [vmem:[%s6145_s4 + $0x628] ss:$16 sps:$4 sm:$0xff]  }
 0x1cf   :  { %2539 = vmatpush1.bf16.msra.mxu0 %v4351_v33  ;;  %v4437_v33 = vld [vmem:[%s6145_s4 + $0x644] ss:$16 sps:$4 sm:$0xff]  }
 0x1d0   :  { %2703 = vmatpush1.bf16.msra.mxu1 %v4354_v35  ;;  %2540 = vmatprep.subr.bf16.mxu0 %v4359_v36  ;;  %v4440_v35 = vld [vmem:[%s6145_s4 + $0x64c] ss:$16 sps:$4 sm:$0xff]   ;;  %v4435_v36 = vld [vmem:[%s6145_s4 + $0x640] ss:$16 sps:$4 sm:$0xff]  }
 0x1d1   :  { %2704 = vmatprep.subr.bf16.mxu1 %v4362_v37  ;;  %v4438_v37 = vld [vmem:[%s6145_s4 + $0x648] ss:$16 sps:$4 sm:$0xff]  }
 0x1d3   :  { %2541 = vmatpush1.bf16.msra.mxu0 %v4357_v38  ;;  %v4443_v38 = vld [vmem:[%s6145_s4 + $0x664] ss:$16 sps:$4 sm:$0xff]  }
 0x1d4   :  { %2705 = vmatpush1.bf16.msra.mxu1 %v4360_v2  ;;  %2542 = vmatprep.subr.bf16.mxu0 %v4365_v39  ;;  %v4446_v2 = vld [vmem:[%s6145_s4 + $0x66c] ss:$16 sps:$4 sm:$0xff]   ;;  %v4441_v39 = vld [vmem:[%s6145_s4 + $0x660] ss:$16 sps:$4 sm:$0xff]  }
 0x1d5   :  { %2706 = vmatprep.subr.bf16.mxu1 %v4368_v40  ;;  %v4444_v40 = vld [vmem:[%s6145_s4 + $0x668] ss:$16 sps:$4 sm:$0xff]  }
 0x1d7   :  { %2543 = vmatpush1.bf16.msra.mxu0 %v4363_v41  ;;  %v4449_v41 = vld [vmem:[%s6145_s4 + $0x684] ss:$16 sps:$4 sm:$0xff]  }
 0x1d8   :  { %2707 = vmatpush1.bf16.msra.mxu1 %v4366_v42  ;;  %2544 = vmatprep.subr.bf16.mxu0 %v4371_v43  ;;  %v4452_v42 = vld [vmem:[%s6145_s4 + $0x68c] ss:$16 sps:$4 sm:$0xff]   ;;  %v4447_v43 = vld [vmem:[%s6145_s4 + $0x680] ss:$16 sps:$4 sm:$0xff]  }
 0x1d9   :  { %2708 = vmatprep.subr.bf16.mxu1 %v4374_v44  ;;  %v4450_v44 = vld [vmem:[%s6145_s4 + $0x688] ss:$16 sps:$4 sm:$0xff]  }
 0x1db   :  { %2545 = vmatpush1.bf16.msra.mxu0 %v4369_v10  ;;  %v4455_v10 = vld [vmem:[%s6145_s4 + $0x6a4] ss:$16 sps:$4 sm:$0xff]  }
 0x1dc   :  { %2709 = vmatpush1.bf16.msra.mxu1 %v4372_v12  ;;  %2546 = vmatprep.subr.bf16.mxu0 %v4377_v14  ;;  %v4458_v12 = vld [vmem:[%s6145_s4 + $0x6ac] ss:$16 sps:$4 sm:$0xff]   ;;  %v4453_v14 = vld [vmem:[%s6145_s4 + $0x6a0] ss:$16 sps:$4 sm:$0xff]  }
 0x1dd   :  { %2710 = vmatprep.subr.bf16.mxu1 %v4380_v19  ;;  %v4456_v19 = vld [vmem:[%s6145_s4 + $0x6a8] ss:$16 sps:$4 sm:$0xff]  }
 0x1df   :  { %2547 = vmatpush1.bf16.msra.mxu0 %v4375_v45  ;;  %v4461_v45 = vld [vmem:[%s6145_s4 + $0x6c4] ss:$16 sps:$4 sm:$0xff]  }
 0x1e0   :  { %2711 = vmatpush1.bf16.msra.mxu1 %v4378_v46  ;;  %2548 = vmatprep.subr.bf16.mxu0 %v4383_v47  ;;  %v4464_v46 = vld [vmem:[%s6145_s4 + $0x6cc] ss:$16 sps:$4 sm:$0xff]   ;;  %v4459_v47 = vld [vmem:[%s6145_s4 + $0x6c0] ss:$16 sps:$4 sm:$0xff]  }
 0x1e1   :  { %2712 = vmatprep.subr.bf16.mxu1 %v4386_v21  ;;  %v4462_v21 = vld [vmem:[%s6145_s4 + $0x6c8] ss:$16 sps:$4 sm:$0xff]  }
 0x1e3   :  { %2549 = vmatpush1.bf16.msra.mxu0 %v4381_v15  ;;  %v4467_v15 = vld [vmem:[%s6145_s4 + $0x6e4] ss:$16 sps:$4 sm:$0xff]  }
 0x1e4   :  { %2713 = vmatpush1.bf16.msra.mxu1 %v4384_v49  ;;  %2550 = vmatprep.subr.bf16.mxu0 %v4389_v34  ;;  %v4470_v49 = vld [vmem:[%s6145_s4 + $0x6ec] ss:$16 sps:$4 sm:$0xff]   ;;  %v4465_v34 = vld [vmem:[%s6145_s4 + $0x6e0] ss:$16 sps:$4 sm:$0xff]  }
 0x1e5   :  { %2714 = vmatprep.subr.bf16.mxu1 %v4392_v50  ;;  %v4468_v50 = vld [vmem:[%s6145_s4 + $0x6e8] ss:$16 sps:$4 sm:$0xff]  }
 0x1e7   :  { %2551 = vmatpush1.bf16.msra.mxu0 %v4387_v32  ;;  %v4473_v32 = vld [vmem:[%s6145_s4 + $0x704] ss:$16 sps:$4 sm:$0xff]  }
 0x1e8   :  { %2715 = vmatpush1.bf16.msra.mxu1 %v4390_v24  ;;  %2552 = vmatprep.subr.bf16.mxu0 %v4395_v51  ;;  %v4476_v24 = vld [vmem:[%s6145_s4 + $0x70c] ss:$16 sps:$4 sm:$0xff]   ;;  %v4471_v51 = vld [vmem:[%s6145_s4 + $0x700] ss:$16 sps:$4 sm:$0xff]  }
 0x1e9   :  { %2716 = vmatprep.subr.bf16.mxu1 %v4398_v52  ;;  %v4474_v52 = vld [vmem:[%s6145_s4 + $0x708] ss:$16 sps:$4 sm:$0xff]  }
 0x1eb   :  { %2553 = vmatpush1.bf16.msra.mxu0 %v4393_v53  ;;  %v4479_v53 = vld [vmem:[%s6145_s4 + $0x724] ss:$16 sps:$4 sm:$0xff]  }
 0x1ec   :  { %2717 = vmatpush1.bf16.msra.mxu1 %v4396_v6  ;;  %2554 = vmatprep.subr.bf16.mxu0 %v4401_v54  ;;  %v4482_v6 = vld [vmem:[%s6145_s4 + $0x72c] ss:$16 sps:$4 sm:$0xff]   ;;  %v4477_v54 = vld [vmem:[%s6145_s4 + $0x720] ss:$16 sps:$4 sm:$0xff]  }
 0x1ed   :  { %2718 = vmatprep.subr.bf16.mxu1 %v4404_v55  ;;  %v4480_v55 = vld [vmem:[%s6145_s4 + $0x728] ss:$16 sps:$4 sm:$0xff]  }
 0x1ef   :  { %2555 = vmatpush1.bf16.msra.mxu0 %v4399_v56  ;;  %v4485_v56 = vld [vmem:[%s6145_s4 + $0x744] ss:$16 sps:$4 sm:$0xff]  }
 0x1f0   :  { %2719 = vmatpush1.bf16.msra.mxu1 %v4402_v57  ;;  %2556 = vmatprep.subr.bf16.mxu0 %v4407_v58  ;;  %v4488_v57 = vld [vmem:[%s6145_s4 + $0x74c] ss:$16 sps:$4 sm:$0xff]   ;;  %v4483_v58 = vld [vmem:[%s6145_s4 + $0x740] ss:$16 sps:$4 sm:$0xff]  }
 0x1f1   :  { %2720 = vmatprep.subr.bf16.mxu1 %v4410_v59  ;;  %v4486_v59 = vld [vmem:[%s6145_s4 + $0x748] ss:$16 sps:$4 sm:$0xff]  }
 0x1f3   :  { %2557 = vmatpush1.bf16.msra.mxu0 %v4405_v60  ;;  %v4491_v60 = vld [vmem:[%s6145_s4 + $0x764] ss:$16 sps:$4 sm:$0xff]  }
 0x1f4   :  { %2721 = vmatpush1.bf16.msra.mxu1 %v4408_v61  ;;  %2558 = vmatprep.subr.bf16.mxu0 %v4413_v62  ;;  %v4494_v61 = vld [vmem:[%s6145_s4 + $0x76c] ss:$16 sps:$4 sm:$0xff]   ;;  %v4489_v62 = vld [vmem:[%s6145_s4 + $0x760] ss:$16 sps:$4 sm:$0xff]  }
 0x1f5   :  { %2722 = vmatprep.subr.bf16.mxu1 %v4416_v63  ;;  %v4492_v63 = vld [vmem:[%s6145_s4 + $0x768] ss:$16 sps:$4 sm:$0xff]  }
 0x1f7   :  { %2559 = vmatpush1.bf16.msra.mxu0 %v4411_v26  ;;  %v4497_v26 = vld [vmem:[%s6145_s4 + $0x784] ss:$16 sps:$4 sm:$0xff]  }
 0x1f8   :  { %2723 = vmatpush1.bf16.msra.mxu1 %v4414_v0  ;;  %2560 = vmatprep.subr.bf16.mxu0 %v4419_v1  ;;  %v4500_v0 = vld [vmem:[%s6145_s4 + $0x78c] ss:$16 sps:$4 sm:$0xff]   ;;  %v4495_v1 = vld [vmem:[%s6145_s4 + $0x780] ss:$16 sps:$4 sm:$0xff]  }
 0x1f9   :  { %2724 = vmatprep.subr.bf16.mxu1 %v4422_v29  ;;  %v4498_v29 = vld [vmem:[%s6145_s4 + $0x788] ss:$16 sps:$4 sm:$0xff]  }
 0x1fb   :  { %2561 = vmatpush1.bf16.msra.mxu0 %v4417_v5  ;;  %v4503_v5 = vld [vmem:[%s6145_s4 + $0x7a4] ss:$16 sps:$4 sm:$0xff]  }
 0x1fc   :  { %2725 = vmatpush1.bf16.msra.mxu1 %v4420_v9  ;;  %2571 = vmatprep.subr.bf16.mxu0 %v4425_v16  ;;  %v4506_v9 = vld [vmem:[%s6145_s4 + $0x7ac] ss:$16 sps:$4 sm:$0xff]   ;;  %v4504_v16 = vld [vmem:[%s6145_s4 + $0x7a8] ss:$16 sps:$4 sm:$0xff]  }
 0x1fd   :  { %2735 = vmatprep.subr.bf16.mxu1 %v4428_v18  ;;  %v4509_v18 = vld [vmem:[%s6145_s4 + $0x7c4] ss:$16 sps:$4 sm:$0xff]  }
 0x1fe   :  { %2563 = vmatmul.mubr.bf16.vlgmr.msra.gmra.mrb[4].mxu0 %v908_v23 }
 0x1ff   :  { %2727 = vmatmul.mubr.bf16.vlgmr.msra.gmra.mrb[12].mxu1 %v908_v23  ;;  %2572 = vmatpush1.bf16.msra.mxu0 %v4423_v22  ;;  %v4507_v22 = vld [vmem:[%s6145_s4 + $0x7c0] ss:$16 sps:$4 sm:$0xff]   ;;  %v4510_v23 = vld [vmem:[%s6145_s4 + $0x7c8] ss:$16 sps:$4 sm:$0xff]  }
 0x200   :  { %2603 = vmatprep.mubr.bf16.mxu0 %v911_v27  ;;  %2736 = vmatpush1.bf16.msra.mxu1 %v4426_v28  ;;  %v4515_v28 = vld [vmem:[%s6145_s4 + $0x7e4] ss:$16 sps:$4 sm:$0xff]  }
 0x201   :  { %2767 = vmatprep.mubr.bf16.mxu1 %v911_v27  ;;  %2573 = vmatprep.subr.bf16.mxu0 %v4431_v25  ;;  %v4518_v25 = vld [vmem:[%s6145_s4 + $0x7ec] ss:$16 sps:$4 sm:$0xff]   ;;  %v4513_v27 = vld [vmem:[%s6145_s4 + $0x7e0] ss:$16 sps:$4 sm:$0xff]  }
 0x202   :  { %2737 = vmatprep.subr.bf16.mxu1 %v4434_v48  ;;  %v4516_v48 = vld [vmem:[%s6145_s4 + $0x7e8] ss:$16 sps:$4 sm:$0xff]  }
 0x203   :  { %2574 = vmatpush1.bf16.msra.mxu0 %v4429_v30  ;;  %v902_v30 = vmax.f32 %v5262_v17, 0.0  ;;  %v4524_v17 = vld [vmem:[%s6148_s7 + $0x14] ss:$8 sps:$4 sm:$0xff]  }
 0x204   :  { %2738 = vmatpush1.bf16.msra.mxu1 %v4432_v31  ;;  %2575 = vmatprep.subr.bf16.mxu0 %v4437_v33  ;;  %v4521_v33 = vld [vmem:[%s6148_s7 + $0x4] ss:$8 sps:$4 sm:$0xff]  }
 0x205   :  { %2739 = vmatprep.subr.bf16.mxu1 %v4440_v35  ;;  %v910_v31 = vpack.c.bf16 %v902_v30, %v902_v30  ;;  %v4519_v35 = vld [vmem:[%s6148_s7] ss:$8 sps:$4 sm:$0xff]  }
 0x207   :  { %2576 = vmatpush1.bf16.msra.mxu0 %v4435_v36  ;;  %v4522_v36 = vld [vmem:[%s6148_s7 + $0x10] ss:$8 sps:$4 sm:$0xff]  }
 0x208   :  { %2740 = vmatpush1.bf16.msra.mxu1 %v4438_v37  ;;  %2577 = vmatprep.subr.bf16.mxu0 %v4443_v38  ;;  %v4527_v37 = vld [vmem:[%s6148_s7 + $0x24] ss:$8 sps:$4 sm:$0xff]   ;;  %v4525_v38 = vld [vmem:[%s6148_s7 + $0x20] ss:$8 sps:$4 sm:$0xff]  }
 0x209   :  { %2741 = vmatprep.subr.bf16.mxu1 %v4446_v2  ;;  %v4530_v2 = vld [vmem:[%s6148_s7 + $0x34] ss:$8 sps:$4 sm:$0xff]  }
 0x20b   :  { %2578 = vmatpush1.bf16.msra.mxu0 %v4441_v39  ;;  %v4528_v39 = vld [vmem:[%s6148_s7 + $0x30] ss:$8 sps:$4 sm:$0xff]  }
 0x20c   :  { %2742 = vmatpush1.bf16.msra.mxu1 %v4444_v40  ;;  %2579 = vmatprep.subr.bf16.mxu0 %v4449_v41  ;;  %v4533_v40 = vld [vmem:[%s6148_s7 + $0x44] ss:$8 sps:$4 sm:$0xff]   ;;  %v4531_v41 = vld [vmem:[%s6148_s7 + $0x40] ss:$8 sps:$4 sm:$0xff]  }
 0x20d   :  { %2743 = vmatprep.subr.bf16.mxu1 %v4452_v42  ;;  %v4536_v42 = vld [vmem:[%s6148_s7 + $0x54] ss:$8 sps:$4 sm:$0xff]  }
 0x20f   :  { %2580 = vmatpush1.bf16.msra.mxu0 %v4447_v43  ;;  %v4534_v43 = vld [vmem:[%s6148_s7 + $0x50] ss:$8 sps:$4 sm:$0xff]  }
 0x210   :  { %2744 = vmatpush1.bf16.msra.mxu1 %v4450_v44  ;;  %2581 = vmatprep.subr.bf16.mxu0 %v4455_v10  ;;  %v4539_v44 = vld [vmem:[%s6148_s7 + $0x64] ss:$8 sps:$4 sm:$0xff]   ;;  %v4537_v10 = vld [vmem:[%s6148_s7 + $0x60] ss:$8 sps:$4 sm:$0xff]  }
 0x211   :  { %2745 = vmatprep.subr.bf16.mxu1 %v4458_v12  ;;  %v4542_v12 = vld [vmem:[%s6148_s7 + $0x74] ss:$8 sps:$4 sm:$0xff]  }
 0x213   :  { %2582 = vmatpush1.bf16.msra.mxu0 %v4453_v14  ;;  %v4540_v14 = vld [vmem:[%s6148_s7 + $0x70] ss:$8 sps:$4 sm:$0xff]  }
 0x214   :  { %2746 = vmatpush1.bf16.msra.mxu1 %v4456_v19  ;;  %2583 = vmatprep.subr.bf16.mxu0 %v4461_v45  ;;  %v4545_v19 = vld [vmem:[%s6148_s7 + $0x84] ss:$8 sps:$4 sm:$0xff]   ;;  %v4543_v45 = vld [vmem:[%s6148_s7 + $0x80] ss:$8 sps:$4 sm:$0xff]  }
 0x215   :  { %2747 = vmatprep.subr.bf16.mxu1 %v4464_v46  ;;  %v4548_v46 = vld [vmem:[%s6148_s7 + $0x94] ss:$8 sps:$4 sm:$0xff]  }
 0x217   :  { %2584 = vmatpush1.bf16.msra.mxu0 %v4459_v47  ;;  %v4546_v47 = vld [vmem:[%s6148_s7 + $0x90] ss:$8 sps:$4 sm:$0xff]  }
 0x218   :  { %2748 = vmatpush1.bf16.msra.mxu1 %v4462_v21  ;;  %2585 = vmatprep.subr.bf16.mxu0 %v4467_v15  ;;  %v4551_v21 = vld [vmem:[%s6148_s7 + $0xa4] ss:$8 sps:$4 sm:$0xff]   ;;  %v4549_v15 = vld [vmem:[%s6148_s7 + $0xa0] ss:$8 sps:$4 sm:$0xff]  }
 0x219   :  { %2749 = vmatprep.subr.bf16.mxu1 %v4470_v49  ;;  %v4554_v49 = vld [vmem:[%s6148_s7 + $0xb4] ss:$8 sps:$4 sm:$0xff]  }
 0x21b   :  { %2586 = vmatpush1.bf16.msra.mxu0 %v4465_v34  ;;  %v4552_v34 = vld [vmem:[%s6148_s7 + $0xb0] ss:$8 sps:$4 sm:$0xff]  }
 0x21c   :  { %2750 = vmatpush1.bf16.msra.mxu1 %v4468_v50  ;;  %2587 = vmatprep.subr.bf16.mxu0 %v4473_v32  ;;  %v4557_v50 = vld [vmem:[%s6148_s7 + $0xc4] ss:$8 sps:$4 sm:$0xff]   ;;  %v4555_v32 = vld [vmem:[%s6148_s7 + $0xc0] ss:$8 sps:$4 sm:$0xff]  }
 0x21d   :  { %2751 = vmatprep.subr.bf16.mxu1 %v4476_v24  ;;  %v4560_v24 = vld [vmem:[%s6148_s7 + $0xd4] ss:$8 sps:$4 sm:$0xff]  }
 0x21f   :  { %2588 = vmatpush1.bf16.msra.mxu0 %v4471_v51  ;;  %v4558_v51 = vld [vmem:[%s6148_s7 + $0xd0] ss:$8 sps:$4 sm:$0xff]  }
 0x220   :  { %2752 = vmatpush1.bf16.msra.mxu1 %v4474_v52  ;;  %2589 = vmatprep.subr.bf16.mxu0 %v4479_v53  ;;  %v4563_v52 = vld [vmem:[%s6148_s7 + $0xe4] ss:$8 sps:$4 sm:$0xff]   ;;  %v4561_v53 = vld [vmem:[%s6148_s7 + $0xe0] ss:$8 sps:$4 sm:$0xff]  }
 0x221   :  { %2753 = vmatprep.subr.bf16.mxu1 %v4482_v6  ;;  %v4566_v6 = vld [vmem:[%s6148_s7 + $0xf4] ss:$8 sps:$4 sm:$0xff]  }
 0x223   :  { %2590 = vmatpush1.bf16.msra.mxu0 %v4477_v54  ;;  %v4564_v54 = vld [vmem:[%s6148_s7 + $0xf0] ss:$8 sps:$4 sm:$0xff]  }
 0x224   :  { %2754 = vmatpush1.bf16.msra.mxu1 %v4480_v55  ;;  %2591 = vmatprep.subr.bf16.mxu0 %v4485_v56  ;;  %v4569_v55 = vld [vmem:[%s6148_s7 + $0x104] ss:$8 sps:$4 sm:$0xff]  }
 0x225   :  { %2755 = vmatprep.subr.bf16.mxu1 %v4488_v57 }
 0x227   :  { %2592 = vmatpush1.bf16.msra.mxu0 %v4483_v58 }
 0x228   :  { %2756 = vmatpush1.bf16.msra.mxu1 %v4486_v59  ;;  %2593 = vmatprep.subr.bf16.mxu0 %v4491_v60 }
 0x229   :  { %2757 = vmatprep.subr.bf16.mxu1 %v4494_v61 }
 0x22b   :  { %2594 = vmatpush1.bf16.msra.mxu0 %v4489_v62 }
 0x22c   :  { %2758 = vmatpush1.bf16.msra.mxu1 %v4492_v63  ;;  %2595 = vmatprep.subr.bf16.mxu0 %v4497_v26 }
 0x22d   :  { %2759 = vmatprep.subr.bf16.mxu1 %v4500_v0 }
 0x22f   :  { %2596 = vmatpush1.bf16.msra.mxu0 %v4495_v1 }
 0x230   :  { %2760 = vmatpush1.bf16.msra.mxu1 %v4498_v29  ;;  %2597 = vmatprep.subr.bf16.mxu0 %v4503_v5 }
 0x231   :  { %2761 = vmatprep.subr.bf16.mxu1 %v4506_v9 }
 0x233   :  { %2598 = vmatpush1.bf16.msra.mxu0 %v4501_v11 }
 0x234   :  { %2762 = vmatpush1.bf16.msra.mxu1 %v4504_v16  ;;  %2599 = vmatprep.subr.bf16.mxu0 %v4509_v18 }
 0x235   :  { %2763 = vmatprep.subr.bf16.mxu1 %v4512_v20 }
 0x237   :  { %2600 = vmatpush1.bf16.msra.mxu0 %v4507_v22 }
 0x238   :  { %2764 = vmatpush1.bf16.msra.mxu1 %v4510_v23  ;;  %2601 = vmatprep.subr.bf16.mxu0 %v4515_v28 }
 0x239   :  { %2765 = vmatprep.subr.bf16.mxu1 %v4518_v25 }
 0x23b   :  { %2602 = vmatpush1.bf16.msra.mxu0 %v4513_v27 }
 0x23c   :  { %2766 = vmatpush1.bf16.msra.mxu1 %v4516_v48  ;;  %3322 = vmatprep.subr.bf16.mxu0 %v4521_v33 }
 0x23e   :  { %2604 = vmatmul.mubr.bf16.vlgmr.msra.gmra.mrb[4].mxu0 %v910_v31 }
 0x23f   :  { %2768 = vmatmul.mubr.bf16.vlgmr.msra.gmra.mrb[12].mxu1 %v910_v31  ;;  %3323 = vmatpush1.bf16.msra.mxu0 %v4519_v35 }
 0x240   :  { %3324 = vmatprep.subr.bf16.mxu0 %v4524_v17 }
 0x243   :  { %3325 = vmatpush1.bf16.msra.mxu0 %v4522_v36 }
 0x244   :  { %3326 = vmatprep.subr.bf16.mxu0 %v4527_v37 }
 0x247   :  { %3327 = vmatpush1.bf16.msra.mxu0 %v4525_v38 }
 0x248   :  { %3328 = vmatprep.subr.bf16.mxu0 %v4530_v2 }
 0x24b   :  { %3329 = vmatpush1.bf16.msra.mxu0 %v4528_v39 }
 0x24c   :  { %3330 = vmatprep.subr.bf16.mxu0 %v4533_v40 }
 0x24f   :  { %3331 = vmatpush1.bf16.msra.mxu0 %v4531_v41 }
 0x250   :  { %3332 = vmatprep.subr.bf16.mxu0 %v4536_v42 }
 0x253   :  { %3333 = vmatpush1.bf16.msra.mxu0 %v4534_v43 }
 0x254   :  { %3334 = vmatprep.subr.bf16.mxu0 %v4539_v44 }
 0x257   :  { %3335 = vmatpush1.bf16.msra.mxu0 %v4537_v10 }
 0x258   :  { %3336 = vmatprep.subr.bf16.mxu0 %v4542_v12 }
 0x25b   :  { %3337 = vmatpush1.bf16.msra.mxu0 %v4540_v14 }
 0x25c   :  { %3338 = vmatprep.subr.bf16.mxu0 %v4545_v19 }
 0x25f   :  { %3339 = vmatpush1.bf16.msra.mxu0 %v4543_v45 }
 0x260   :  { %3340 = vmatprep.subr.bf16.mxu0 %v4548_v46 }
 0x263   :  { %3341 = vmatpush1.bf16.msra.mxu0 %v4546_v47 }
 0x264   :  { %3342 = vmatprep.subr.bf16.mxu0 %v4551_v21 }
 0x267   :  { %3343 = vmatpush1.bf16.msra.mxu0 %v4549_v15 }
 0x268   :  { %3344 = vmatprep.subr.bf16.mxu0 %v4554_v49 }
 0x26b   :  { %3345 = vmatpush1.bf16.msra.mxu0 %v4552_v34 }
 0x26c   :  { %3346 = vmatprep.subr.bf16.mxu0 %v4557_v50 }
 0x26f   :  { %3347 = vmatpush1.bf16.msra.mxu0 %v4555_v32 }
 0x270   :  { %3348 = vmatprep.subr.bf16.mxu0 %v4560_v24 }
 0x273   :  { %3349 = vmatpush1.bf16.msra.mxu0 %v4558_v51 }
 0x274   :  { %3350 = vmatprep.subr.bf16.mxu0 %v4563_v52 }
 0x277   :  { %3351 = vmatpush1.bf16.msra.mxu0 %v4561_v53 }
 0x278   :  { %3352 = vmatprep.subr.bf16.mxu0 %v4566_v6 }
 0x27b   :  { %3353 = vmatpush1.bf16.msra.mxu0 %v4564_v54 }
 0x27c   :  { %3363 = vmatprep.subr.bf16.mxu0 %v4569_v55 }
 0x311   :  { %v2605_v56 = vpop.f32.mrb[4].mxu0 }
 0x312   :  { %v2776_v57 = vrot.slane %v2605_v56, 4  ;;  %v2769_v58 = vpop.f32.mrb[12].mxu1  ;;  %v2607_v59 = vpop.f32.mrb[5].mxu0 }
 0x313   :  { %v2788_v60 = vrot.slane %v2769_v58, 4  ;;  %v2782_v61 = vrot.slane %v2607_v59, 4  ;;  %v2771_v62 = vpop.f32.mrb[13].mxu1  ;;  %v2609_v63 = vpop.f32.mrb[6].mxu0 }
 0x314   :  { %v2777_v26 = vadd.f32 %v2776_v57, %v2605_v56  ;;  %v2794_v0 = vrot.slane %v2771_v62, 4  ;;  %v2773_v1 = vpop.f32.mrb[14].mxu1  ;;  %v2610_v29 = vpop.f32.mrb[7].mxu0 }
 0x315   :  { %v2789_v5 = vadd.f32 %v2788_v60, %v2769_v58  ;;  %v2783_v9 = vadd.f32 %v2782_v61, %v2607_v59  ;;  %v2774_v11 = vpop.f32.mrb[15].mxu1 }
 0x316   :  { %v2778_v16 = vrot.slane %v2777_v26, 2  ;;  %v2795_v18 = vadd.f32 %v2794_v0, %v2771_v62 }
 0x317   :  { %v2790_v20 = vrot.slane %v2789_v5, 2  ;;  %v2784_v22 = vrot.slane %v2783_v9, 2 }
 0x318   :  { %v2779_v23 = vadd.f32 %v2778_v16, %v2777_v26  ;;  %v2796_v28 = vrot.slane %v2795_v18, 2 }
 0x319   :  { %v2791_v25 = vadd.f32 %v2790_v20, %v2789_v5  ;;  %v2785_v27 = vadd.f32 %v2784_v22, %v2783_v9 }
 0x31a   :  { %v2780_v48 = vrot.slane %v2779_v23, 1  ;;  %v2797_v30 = vadd.f32 %v2796_v28, %v2795_v18 }
 0x31b   :  { %v2792_v31 = vrot.slane %v2791_v25, 1  ;;  %v2786_v33 = vrot.slane %v2785_v27, 1 }
 0x31c   :  { %v2781_v35 = vadd.f32 %v2780_v48, %v2779_v23  ;;  %v2798_v17 = vrot.slane %v2797_v30, 1 }
 0x31d   :  { %v2793_v36 = vadd.f32 %v2792_v31, %v2791_v25  ;;  %v2787_v37 = vadd.f32 %v2786_v33, %v2785_v27  ;;  %v2840_v33 = vld [vmem:[%s6146_s5] sm:$0xf] }
 0x31e   :  { %v2800_v38 = vmul.f32 0.125, %v2781_v35  ;;  %v2799_v2 = vadd.f32 %v2798_v17, %v2797_v30  ;;  %v2904_v17 = vld [vmem:[%s6147_s6] sm:$0xf] }
 0x31f   :  { %v2802_v39 = vmul.f32 0.125, %v2793_v36  ;;  %v2801_v40 = vmul.f32 0.125, %v2787_v37  ;;  %v2913_v37 = vrot.slane %v2904_v17, %v5224_v3 }
 0x320   :  { %v5938_v41 = vsub.f32 %v2605_v56, %v2800_v38  ;;  %v2803_v42 = vmul.f32 0.125, %v2799_v2  ;;  %v2909_v38 = vrot.slane %v2904_v17, %v5227_v7  ;;  %v2921_v2 = vrot.slane %v2904_v17, %v5230_v8 }
 0x321   :  { %v5940_v43 = vsub.f32 %v2769_v58, %v2802_v39  ;;  %v5942_v44 = vsub.f32 %v2607_v59, %v2801_v40  ;;  %v2917_v39 = vrot.slane %v2904_v17, %v5233_v4  ;;  %v4619_v17 = vld [vmem:[%s6151_s10 + $0x50] sm:$0xff]  }
 0x322   :  { %v2808_v10 = vmul.f32 %v5938_v41, %v5938_v41  ;;  %v2807_v12 = vsub.f32 %v2771_v62, %v2803_v42 }
 0x323   :  { %v2810_v14 = vmul.f32 %v5940_v43, %v5940_v43  ;;  %v2809_v19 = vmul.f32 %v5942_v44, %v5942_v44 }
 0x324   :  { %v2812_v45 = vrot.slane %v2808_v10, 4  ;;  %v2811_v46 = vmul.f32 %v2807_v12, %v2807_v12 }
 0x325   :  { %v2824_v47 = vrot.slane %v2810_v14, 4  ;;  %v2818_v21 = vrot.slane %v2809_v19, 4 }
 0x326   :  { %v2813_v15 = vadd.f32 %v2812_v45, %v2808_v10  ;;  %v2830_v49 = vrot.slane %v2811_v46, 4 }
 0x327   :  { %v2825_v34 = vadd.f32 %v2824_v47, %v2810_v14  ;;  %v2819_v50 = vadd.f32 %v2818_v21, %v2809_v19 }
 0x328   :  { %v2814_v32 = vrot.slane %v2813_v15, 2  ;;  %v2831_v24 = vadd.f32 %v2830_v49, %v2811_v46 }
 0x329   :  { %v2826_v51 = vrot.slane %v2825_v34, 2  ;;  %v2820_v52 = vrot.slane %v2819_v50, 2 }
 0x32a   :  { %v2815_v53 = vadd.f32 %v2814_v32, %v2813_v15  ;;  %v2832_v6 = vrot.slane %v2831_v24, 2 }
 0x32b   :  { %v2827_v54 = vadd.f32 %v2826_v51, %v2825_v34  ;;  %v2821_v55 = vadd.f32 %v2820_v52, %v2819_v50  ;;  %v4575_v51 = vld [vmem:[%s6148_s7 + $0x124] ss:$8 sps:$4 sm:$0xff]   ;;  %v4573_v52 = vld [vmem:[%s6148_s7 + $0x120] ss:$8 sps:$4 sm:$0xff]  }
 0x32c   :  { %v2816_v56 = vrot.slane %v2815_v53, 1  ;;  %v2833_v57 = vadd.f32 %v2832_v6, %v2831_v24  ;;  %v4576_v6 = vld [vmem:[%s6148_s7 + $0x130] ss:$8 sps:$4 sm:$0xff]  }
 0x32d   :  { %v2828_v58 = vrot.slane %v2827_v54, 1  ;;  %v2822_v59 = vrot.slane %v2821_v55, 1 }
 0x32e   :  { %v2817_v60 = vadd.f32 %v2816_v56, %v2815_v53  ;;  %v2834_v61 = vrot.slane %v2833_v57, 1  ;;  %v4578_v53 = vld [vmem:[%s6148_s7 + $0x134] ss:$8 sps:$4 sm:$0xff]  }
 0x32f   :  { %v2829_v62 = vadd.f32 %v2828_v58, %v2827_v54  ;;  %v2823_v63 = vadd.f32 %v2822_v59, %v2821_v55  ;;  %v4581_v54 = vld [vmem:[%s6148_s7 + $0x144] ss:$8 sps:$4 sm:$0xff]   ;;  %v4579_v55 = vld [vmem:[%s6148_s7 + $0x140] ss:$8 sps:$4 sm:$0xff]   ;;  %v4584_v56 = vld [vmem:[%s6148_s7 + $0x154] ss:$8 sps:$4 sm:$0xff]  }
 0x330   :  { %v2836_v26 = vmul.f32 0.125, %v2817_v60  ;;  %v2835_v0 = vadd.f32 %v2834_v61, %v2833_v57  ;;  %v4582_v57 = vld [vmem:[%s6148_s7 + $0x150] ss:$8 sps:$4 sm:$0xff]   ;;  %v4587_v58 = vld [vmem:[%s6148_s7 + $0x164] ss:$8 sps:$4 sm:$0xff]  }
 0x331   :  { %v2838_v1 = vmul.f32 0.125, %v2829_v62  ;;  %v2837_v29 = vmul.f32 0.125, %v2823_v63  ;;  %v4585_v59 = vld [vmem:[%s6148_s7 + $0x160] ss:$8 sps:$4 sm:$0xff]   ;;  %v4590_v60 = vld [vmem:[%s6148_s7 + $0x174] ss:$8 sps:$4 sm:$0xff]  }
 0x332   :  { %v2841_v5 = vadd.f32 1e-05, %v2836_v26  ;;  %v2839_v9 = vmul.f32 0.125, %v2835_v0  ;;  %v4588_v61 = vld [vmem:[%s6148_s7 + $0x170] ss:$8 sps:$4 sm:$0xff]  }
 0x333   :  { %v2843_v11 = vadd.f32 1e-05, %v2838_v1  ;;  %v2842_v16 = vadd.f32 1e-05, %v2837_v29  ;;  %v4593_v62 = vld [vmem:[%s6148_s7 + $0x184] ss:$8 sps:$4 sm:$0xff]  }
 0x334   :  { %4647 = vrsqrt.f32 %v2841_v5  ;;  %v2844_v18 = vadd.f32 1e-05, %v2839_v9  ;;  %v4591_v63 = vld [vmem:[%s6148_s7 + $0x180] ss:$8 sps:$4 sm:$0xff]   ;;  %v4596_v26 = vld [vmem:[%s6148_s7 + $0x194] ss:$8 sps:$4 sm:$0xff]  }
 0x335   :  { %4649 = vrsqrt.f32 %v2843_v11  ;;  %v4594_v0 = vld [vmem:[%s6148_s7 + $0x190] ss:$8 sps:$4 sm:$0xff]   ;;  %v4599_v1 = vld [vmem:[%s6148_s7 + $0x1a4] ss:$8 sps:$4 sm:$0xff]   ;;  %v4597_v29 = vld [vmem:[%s6148_s7 + $0x1a0] ss:$8 sps:$4 sm:$0xff]  }
 0x336   :  { %4651 = vrsqrt.f32 %v2842_v16  ;;  %v4602_v5 = vld [vmem:[%s6148_s7 + $0x1b4] ss:$8 sps:$4 sm:$0xff]   ;;  %v4600_v9 = vld [vmem:[%s6148_s7 + $0x1b0] ss:$8 sps:$4 sm:$0xff]   ;;  %v4605_v11 = vld [vmem:[%s6148_s7 + $0x1c4] ss:$8 sps:$4 sm:$0xff]  }
 0x337   :  { %4653 = vrsqrt.f32 %v2844_v18  ;;  %v4603_v16 = vld [vmem:[%s6148_s7 + $0x1c0] ss:$8 sps:$4 sm:$0xff]   ;;  %v4608_v18 = vld [vmem:[%s6148_s7 + $0x1d4] ss:$8 sps:$4 sm:$0xff]  }
 0x33e   :  { %v4648_v20 = vpop.eup %4647 }
 0x33f   :  { %v4650_v22 = vpop.eup %4649 }
 0x340   :  { %v4652_v23 = vpop.eup %4651 }
 0x341   :  { %v4654_v28 = vpop.eup %4653  ;;  %v2853_v25 = vcombine.low %v4648_v20, %v4652_v23  ;;  %v4606_v20 = vld [vmem:[%s6148_s7 + $0x1d0] ss:$8 sps:$4 sm:$0xff]   ;;  %v4609_v23 = vld [vmem:[%s6148_s7 + $0x1e0] ss:$8 sps:$4 sm:$0xff]  }
 0x342   :  { %v2854_v27 = vcombine.low %v4650_v22, %v4654_v28  ;;  %v4611_v22 = vld [vmem:[%s6148_s7 + $0x1e4] ss:$8 sps:$4 sm:$0xff]   ;;  %v4614_v28 = vld [vmem:[%s6148_s7 + $0x1f4] ss:$8 sps:$4 sm:$0xff]  }
 0x343   :  { %v2861_v48 = vrot.slane %v2853_v25, %v5197_v13  ;;  %v4612_v25 = vld [vmem:[%s6148_s7 + $0x1f0] ss:$8 sps:$4 sm:$0xff]  }
 0x344   :  { %v2868_v30 = vrot.slane %v2854_v27, %v5197_v13 }
 0x346   :  { %v2869_v31 = vcombine.low %v2861_v48, %v2868_v30  ;;  %v4615_v30 = vld [vmem:[%s6151_s10 + $0x40] sm:$0xff]  }
 0x347   :  { %4082 = vmatprep.subr.bf16.mxu1 %v4615_v30 }
 0x348   :  { %v2876_v35 = vrot.slane %v2869_v31, %v5197_v13  ;;  %v4616_v31 = vld [vmem:[%s6151_s10] sm:$0xff]  }
 0x349   :  { %4083 = vmatpush3.bf16.msra.mxu1 %v4616_v31 }
 0x34a   :  { %v2878_v36 = vmul.f32 %v2876_v35, %v2840_v33  ;;  %v4617_v33 = vld [vmem:[%s6151_s10 + $0x48] sm:$0xff]  }
 0x34b   :  { %v4618_v35 = vld [vmem:[%s6151_s10 + $0x8] sm:$0xff]   ;;  %4084 = vmatprep.subr.bf16.mxu1 %v4617_v33 }
 0x34c   :  { %v2895_v40 = vrot.slane %v2878_v36, %v5230_v8  ;;  %v2887_v42 = vrot.slane %v2878_v36, %v5224_v3  ;;  %v2883_v10 = vrot.slane %v2878_v36, %v5227_v7  ;;  %v2891_v14 = vrot.slane %v2878_v36, %v5233_v4  ;;  %v4567_v4 = vld [vmem:[%s6148_s7 + $0x100] ss:$8 sps:$4 sm:$0xff]   ;;  %v4620_v36 = vld [vmem:[%s6151_s10 + $0x10] sm:$0xff]  }
 0x34d   :  { %4085 = vmatpush3.bf16.msra.mxu1 %v4618_v35 }
 0x34e   :  { %v2903_v19 = vmul.f32 %v2895_v40, %v2807_v12  ;;  %v2901_v45 = vmul.f32 %v2887_v42, %v5942_v44  ;;  %v2900_v46 = vmul.f32 %v2883_v10, %v5938_v41  ;;  %v2902_v47 = vmul.f32 %v2891_v14, %v5940_v43  ;;  %v4572_v41 = vld [vmem:[%s6148_s7 + $0x114] ss:$8 sps:$4 sm:$0xff]   ;;  %v4570_v44 = vld [vmem:[%s6148_s7 + $0x110] ss:$8 sps:$4 sm:$0xff]   ;;  %4086 = vmatprep.subr.bf16.mxu1 %v4619_v17  ;;  %v4625_v40 = vld [vmem:[%s6151_s10 + $0x68] sm:$0xff]  }
 0x34f   :  { %v4626_v42 = vld [vmem:[%s6151_s10 + $0x28] sm:$0xff]   ;;  %v4627_v10 = vld [vmem:[%s6151_s10 + $0x70] sm:$0xff]  }
 0x350   :  { %v2927_v21 = vadd.f32 %v2913_v37, %v2901_v45  ;;  %v2926_v15 = vadd.f32 %v2909_v38, %v2900_v46  ;;  %v2929_v49 = vadd.f32 %v2921_v2, %v2903_v19  ;;  %v5970_v34 = vadd.f32 %v2917_v39, %v2902_v47  ;;  %v4621_v37 = vld [vmem:[%s6151_s10 + $0x58] sm:$0xff]   ;;  %v4623_v2 = vld [vmem:[%s6151_s10 + $0x60] sm:$0xff]   ;;  %v4628_v14 = vld [vmem:[%s6151_s10 + $0x30] sm:$0xff]  }
 0x351   :  { %4087 = vmatpush3.bf16.msra.mxu1 %v4620_v36  ;;  %v4622_v38 = vld [vmem:[%s6151_s10 + $0x18] sm:$0xff]   ;;  %v4624_v39 = vld [vmem:[%s6151_s10 + $0x20] sm:$0xff]  }
 0x352   :  { %v2931_v50 = vmax.f32 %v2927_v21, 0.0  ;;  %v2930_v8 = vmax.f32 %v2926_v15, 0.0  ;;  %v2933_v32 = vmax.f32 %v2929_v49, 0.0  ;;  %v2932_v27 = vmax.f32 %v5970_v34, 0.0  ;;  %4088 = vmatprep.subr.bf16.mxu1 %v4621_v37  ;;  %v4629_v19 = vld [vmem:[%s6151_s10 + $0x78] sm:$0xff]  }
 0x353   :  { %v4630_v45 = vld [vmem:[%s6151_s10 + $0x38] sm:$0xff]  }
 0x354   :  { %v2935_v24 = vpack.c.bf16 %v2931_v50, %v2931_v50  ;;  %v2934_v12 = vpack.c.bf16 %v2930_v8, %v2930_v8  ;;  %v2937_v43 = vpack.c.bf16 %v2933_v32, %v2933_v32  ;;  %v2936_v48 = vpack.c.bf16 %v2932_v27, %v2932_v27 }
 0x355   :  { %4089 = vmatpush3.bf16.msra.mxu1 %v4622_v38 }
 0x356   :  { %3354 = vmatprep.mubr.bf16.mxu0 %v2935_v24  ;;  %4090 = vmatprep.subr.bf16.mxu1 %v4623_v2 }
 0x357   :  { %3355 = vmatmul.mubr.bf16.vlgmr.msra.gmra.mrb[8].mxu0 %v2934_v12 }
 0x358   :  { %3364 = vmatpush1.bf16.msra.mxu0 %v4567_v4  ;;  %3395 = vmatprep.mubr.bf16.mxu0 %v2937_v43 }
 0x359   :  { %3365 = vmatprep.subr.bf16.mxu0 %v4572_v41  ;;  %4091 = vmatpush3.bf16.msra.mxu1 %v4624_v39 }
 0x35a   :  { %4092 = vmatprep.subr.bf16.mxu1 %v4625_v40 }
 0x35c   :  { %3366 = vmatpush1.bf16.msra.mxu0 %v4570_v44 }
 0x35d   :  { %3367 = vmatprep.subr.bf16.mxu0 %v4575_v51  ;;  %4093 = vmatpush3.bf16.msra.mxu1 %v4626_v42 }
 0x35e   :  { %4094 = vmatprep.subr.bf16.mxu1 %v4627_v10 }
 0x360   :  { %3368 = vmatpush1.bf16.msra.mxu0 %v4573_v52 }
 0x361   :  { %3369 = vmatprep.subr.bf16.mxu0 %v4578_v53  ;;  %4095 = vmatpush3.bf16.msra.mxu1 %v4628_v14 }
 0x362   :  { %4096 = vmatprep.subr.bf16.mxu1 %v4629_v19  ;;  %v4065_v19 = vld [vmem:[%s6152_s11] ss:$0 sm:$0xff] }
 0x364   :  { %3370 = vmatpush1.bf16.msra.mxu0 %v4576_v6 }
 0x365   :  { %3371 = vmatprep.subr.bf16.mxu0 %v4581_v54  ;;  %4097 = vmatpush3.bf16.msra.mxu1 %v4630_v45 }
 0x368   :  { %3372 = vmatpush1.bf16.msra.mxu0 %v4579_v55 }
 0x369   :  { %3373 = vmatprep.subr.bf16.mxu0 %v4584_v56 }
 0x36c   :  { %3374 = vmatpush1.bf16.msra.mxu0 %v4582_v57 }
 0x36d   :  { %3375 = vmatprep.subr.bf16.mxu0 %v4587_v58 }
 0x370   :  { %3376 = vmatpush1.bf16.msra.mxu0 %v4585_v59 }
 0x371   :  { %3377 = vmatprep.subr.bf16.mxu0 %v4590_v60 }
 0x374   :  { %3378 = vmatpush1.bf16.msra.mxu0 %v4588_v61 }
 0x375   :  { %3379 = vmatprep.subr.bf16.mxu0 %v4593_v62 }
 0x378   :  { %3380 = vmatpush1.bf16.msra.mxu0 %v4591_v63 }
 0x379   :  { %3381 = vmatprep.subr.bf16.mxu0 %v4596_v26 }
 0x37c   :  { %3382 = vmatpush1.bf16.msra.mxu0 %v4594_v0 }
 0x37d   :  { %3383 = vmatprep.subr.bf16.mxu0 %v4599_v1 }
 0x380   :  { %3384 = vmatpush1.bf16.msra.mxu0 %v4597_v29 }
 0x381   :  { %3385 = vmatprep.subr.bf16.mxu0 %v4602_v5 }
 0x384   :  { %3386 = vmatpush1.bf16.msra.mxu0 %v4600_v9 }
 0x385   :  { %3387 = vmatprep.subr.bf16.mxu0 %v4605_v11 }
 0x388   :  { %3388 = vmatpush1.bf16.msra.mxu0 %v4603_v16 }
 0x389   :  { %3389 = vmatprep.subr.bf16.mxu0 %v4608_v18 }
 0x38c   :  { %3390 = vmatpush1.bf16.msra.mxu0 %v4606_v20 }
 0x38d   :  { %3391 = vmatprep.subr.bf16.mxu0 %v4611_v22 }
 0x390   :  { %3392 = vmatpush1.bf16.msra.mxu0 %v4609_v23 }
 0x391   :  { %3393 = vmatprep.subr.bf16.mxu0 %v4614_v28 }
 0x394   :  { %3394 = vmatpush1.bf16.msra.mxu0 %v4612_v25  ;;  %v3436_v25 = vld [vmem:[%s6149_s8] sm:$0x3] }
 0x397   :  { %3396 = vmatmul.mubr.bf16.vlgmr.msra.gmra.mrb[8].mxu0 %v2936_v48  ;;  %v3473_v48 = vld [vmem:[%s6150_s9] sm:$0x3] }
 0x398   :  { %v3478_v35 = vrot.slane %v3473_v48, %v5227_v7  ;;  %v3482_v17 = vrot.slane %v3473_v48, %v5224_v3 }
 0x46a   :  { %v3397_v46 = vpop.f32.mrb[8].mxu0 }
 0x46b   :  { %v3404_v47 = vrot.slane %v3397_v46, 4  ;;  %v3399_v21 = vpop.f32.mrb[9].mxu0 }
 0x46c   :  { %v3410_v15 = vrot.slane %v3399_v21, 4  ;;  %v3401_v49 = vpop.f32.mrb[10].mxu0 }
 0x46d   :  { %v3405_v34 = vadd.f32 %v3404_v47, %v3397_v46  ;;  %v3402_v50 = vpop.f32.mrb[11].mxu0 }
 0x46e   :  { %v3411_v8 = vadd.f32 %v3410_v15, %v3399_v21 }
 0x46f   :  { %v3406_v32 = vrot.slane %v3405_v34, 2 }
 0x470   :  { %v3412_v24 = vrot.slane %v3411_v8, 2 }
 0x471   :  { %v3407_v4 = vadd.f32 %v3406_v32, %v3405_v34 }
 0x472   :  { %v3413_v12 = vadd.f32 %v3412_v24, %v3411_v8 }
 0x473   :  { %v3408_v41 = vrot.slane %v3407_v4, 1 }
 0x474   :  { %v3414_v43 = vrot.slane %v3413_v12, 1 }
 0x475   :  { %v3409_v44 = vadd.f32 %v3408_v41, %v3407_v4 }
 0x476   :  { %v3415_v51 = vadd.f32 %v3414_v43, %v3413_v12 }
 0x477   :  { %v3416_v52 = vmul.f32 0.125, %v3409_v44 }
 0x478   :  { %v3417_v53 = vmul.f32 0.125, %v3415_v51 }
 0x479   :  { %v3418_v6 = vsub.f32 %v3397_v46, %v3416_v52 }
 0x47a   :  { %v3419_v54 = vsub.f32 %v3399_v21, %v3417_v53 }
 0x47b   :  { %v3420_v55 = vmul.f32 %v3418_v6, %v3418_v6 }
 0x47c   :  { %v3421_v56 = vmul.f32 %v3419_v54, %v3419_v54 }
 0x47d   :  { %v3422_v57 = vrot.slane %v3420_v55, 4 }
 0x47e   :  { %v3428_v58 = vrot.slane %v3421_v56, 4 }
 0x47f   :  { %v3423_v59 = vadd.f32 %v3422_v57, %v3420_v55 }
 0x480   :  { %v3429_v60 = vadd.f32 %v3428_v58, %v3421_v56 }
 0x481   :  { %v3424_v61 = vrot.slane %v3423_v59, 2 }
 0x482   :  { %v3430_v62 = vrot.slane %v3429_v60, 2 }
 0x483   :  { %v3425_v63 = vadd.f32 %v3424_v61, %v3423_v59 }
 0x484   :  { %v3431_v26 = vadd.f32 %v3430_v62, %v3429_v60 }
 0x485   :  { %v3426_v0 = vrot.slane %v3425_v63, 1 }
 0x486   :  { %v3432_v1 = vrot.slane %v3431_v26, 1 }
 0x487   :  { %v3427_v29 = vadd.f32 %v3426_v0, %v3425_v63 }
 0x488   :  { %v3433_v5 = vadd.f32 %v3432_v1, %v3431_v26 }
 0x489   :  { %v3434_v9 = vmul.f32 0.125, %v3427_v29 }
 0x48a   :  { %v3435_v11 = vmul.f32 0.125, %v3433_v5 }
 0x48b   :  { %v3437_v16 = vadd.f32 1e-05, %v3434_v9 }
 0x48c   :  { %v3438_v18 = vadd.f32 1e-05, %v3435_v11 }
 0x48d   :  { %4655 = vrsqrt.f32 %v3437_v16 }
 0x48e   :  { %4657 = vrsqrt.f32 %v3438_v18 }
 0x497   :  { %v4656_v20 = vpop.eup %4655 }
 0x498   :  { %v4658_v22 = vpop.eup %4657 }
 0x499   :  { %v3443_v23 = vcombine.low %v4656_v20, %v4658_v22 }
 0x49b   :  { %v3450_v28 = vrot.slane %v3443_v23, %v5197_v13 }
 0x49d   :  { %v3457_v27 = vrot.slane %v3450_v28, %v5197_v13 }
 0x49f   :  { %v3459_v30 = vmul.f32 %v3457_v27, %v3436_v25 }
 0x4a1   :  { %v3464_v31 = vrot.slane %v3459_v30, %v5227_v7  ;;  %v3468_v33 = vrot.slane %v3459_v30, %v5224_v3 }
 0x4a3   :  { %v3472_v36 = vmul.f32 %v3468_v33, %v3419_v54  ;;  %v3471_v37 = vmul.f32 %v3464_v31, %v3418_v6 }
 0x4a5   :  { %v3486_v38 = vadd.f32 %v3482_v17, %v3472_v36  ;;  %v3485_v2 = vadd.f32 %v3478_v35, %v3471_v37 }
 0x4a7   :  { %v3488_v39 = vmax.f32 %v3486_v38, 0.0  ;;  %v3487_v40 = vmax.f32 %v3485_v2, 0.0 }
 0x4a9   :  { %v3490_v13 = vpack.c.bf16 %v3488_v39, %v3488_v39  ;;  %v3489_v42 = vpack.c.bf16 %v3487_v40, %v3487_v40 }
 0x4ab   :  { %3658 = vmatprep.mubr.bf16.mxu1 %v3490_v13 }
 0x4ac   :  { %3659 = vmatmul.mubr.bf16.vlgmr.msra.gmra.mrb[16].mxu1 %v3489_v42 }
 0x57f   :  { %v4098_v10 = vpop.f32.mrb[16].mxu1 }
 0x580   :  { %v4099_v14 = vpop.f32.mrb[17].mxu1 }
 0x581   :  { %v4100_v7 = vadd.f32 %v4099_v14, %v4098_v10  ;;  %v4101_v3 = vpop.f32.mrb[18].mxu1 }
 0x582   :  { %v4102_v45 = vpop.f32.mrb[19].mxu1 }
 0x583   :  { %v3661_v46 = vadd.f32 %v4100_v7, %v4065_v19 }
 0x585   :  { %3666 = vst [vmem:[#allocation2] sm:$0xff] %v3661_v46 }
 0x586   :  { %4670 = shalt.err (!%p4667_p4)
}
 0x587   :  { %s4671_s5 = scalar_lea.hbm %s6153_s12, 128 }
 0x588   :  { %p4672_p5 = scmp.ne.s32.totalorder %s6153_s12, %s4671_s5  ;;  %p4675_p6 = scmp.lt.u32.totalorder %s4671_s5, %s6153_s12 }
 0x58a   :  { %p4677_p7 = pnand %p4675_p6, %p4672_p5 }
 0x58c   :  { %4680 = shalt.err (!%p4677_p7)
}
 0x58d   :  { %3676 = dma.vmem_to_hbm [thread:$0]  %s3674_s19, 128, %s6153_s12, [#allocation3]  }
 0x58e   :  { %4681 = dma.done.wait [#allocation3], 128  }
 0x58f   :  { %4682 = vsyncadd [#allocation3], 4294967168 }
 0x590   :  { %3680 = vsyncpa [#allocation3], 1 }

</bundles_post_ra>
